<compile_context>
chip_gen: v7x
topology: tpu7x:2x2x1
jax: 0.10.0
libtpu: 0.0.40
codegen_flags: <defaults>
</compile_context>

<pallas_src>
import functools

import jax
import jax.numpy as jnp
from jax.experimental import pallas as pl
from jax.experimental.pallas import tpu as pltpu


def _round_up(n, m):
    return ((n + m - 1) // m) * m


# ---------------------------------------------------------------------------
# Pallas kernel: grid = (batch_tiles, num_layers); layers stream, batch parallel.
# ---------------------------------------------------------------------------
def dgm_kernel(
    x_ref,        # (Bt, Dp)            resident per batch tile
    win_ref,      # (Dp, Hp)            resident
    bin_ref,      # (1, Hp)             resident
    uwzgr_ref,    # (1, Dp+Hp, 3*Hp)    streamed per layer
    bzgr_ref,     # (1, 1, 3*Hp)        streamed per layer
    uwh_ref,      # (1, Dp+Hp, Hp)      streamed per layer
    bh_ref,       # (1, 1, Hp)          streamed per layer
    wout_ref,     # (Hp, Op)            resident
    bout_ref,     # (1, Op)             resident
    out_ref,      # (Bt, Op)
    xs_ref,       # VMEM scratch (Bt, Dp+Hp): [x | s]
    xsr_ref,      # VMEM scratch (Bt, Dp+Hp): [x | s*R]
    *, d_pad, h_pad, num_layers,
):
    l = pl.program_id(1)

    # ---- init at first layer of each batch tile: x_in Linear + ReLU ----------
    @pl.when(l == 0)
    def _init():
        x = x_ref[...]
        s0 = jnp.maximum(
            jnp.dot(x, win_ref[...], preferred_element_type=jnp.float32)
            + bin_ref[...], 0.0)
        xs_ref[:, :d_pad] = x
        xsr_ref[:, :d_pad] = x
        xs_ref[:, d_pad:] = s0

    xs = xs_ref[...]                          # [x | s]
    s = xs[:, d_pad:]

    # ---- Z, G, R in a single fused MXU call ----------------------------------
    zgr = jnp.maximum(
        jnp.dot(xs, uwzgr_ref[0], preferred_element_type=jnp.float32)
        + bzgr_ref[0], 0.0)
    z = zgr[:, :h_pad]
    g = zgr[:, h_pad:2 * h_pad]
    r = zgr[:, 2 * h_pad:]

    # ---- H gate: [x | s*R] @ [[Uh]; [Wh]] -------------------------------------
    xsr_ref[:, d_pad:] = s * r
    h = jnp.maximum(
        jnp.dot(xsr_ref[...], uwh_ref[0], preferred_element_type=jnp.float32)
        + bh_ref[0], 0.0)

    # ---- state update ---------------------------------------------------------
    s_new = (1.0 - g) * h + z * s
    xs_ref[:, d_pad:] = s_new

    # ---- finalize: x_out Linear ----------------------------------------------
    @pl.when(l == num_layers - 1)
    def _final():
        out_ref[...] = (
            jnp.dot(s_new, wout_ref[...], preferred_element_type=jnp.float32)
            + bout_ref[...])


# ---------------------------------------------------------------------------
# Wrapper: pack/pad weights once, then a single pallas_call.
# ---------------------------------------------------------------------------
def pack_dgm_params(params, d_pad, h_pad, o_pad):
    """Zero-pad to lane-dense dims and fuse per-gate weights (done once)."""
    (win, bin_, uz, ug, ur, uh, wz, wg, wr, wh, bz, bg, br, bh, wout, bout) = params
    D, H = win.shape
    O = wout.shape[1]

    def pad2(a, r, c):
        return jnp.pad(a, ((0, r - a.shape[0]), (0, c - a.shape[1])))

    win_p = pad2(win, d_pad, h_pad)
    bin_p = pad2(bin_, 1, h_pad)
    wout_p = pad2(wout, h_pad, o_pad)
    bout_p = pad2(bout, 1, o_pad)

    def pad_uw(u, w):  # (L, D, H), (L, H, H) -> (L, d_pad + h_pad, h_pad)
        u_p = jnp.pad(u, ((0, 0), (0, d_pad - D), (0, h_pad - H)))
        w_p = jnp.pad(w, ((0, 0), (0, h_pad - H), (0, h_pad - H)))
        return jnp.concatenate([u_p, w_p], axis=1)

    uwzgr = jnp.concatenate(
        [pad_uw(uz, wz), pad_uw(ug, wg), pad_uw(ur, wr)], axis=2)  # (L, Kc, 3Hp)
    uwh = pad_uw(uh, wh)                                           # (L, Kc, Hp)

    def pad_b(b):  # (L, 1, H) -> (L, 1, h_pad)
        return jnp.pad(b, ((0, 0), (0, 0), (0, h_pad - H)))

    bzgr = jnp.concatenate([pad_b(bz), pad_b(bg), pad_b(br)], axis=2)  # (L,1,3Hp)
    bh_p = pad_b(bh)                                                   # (L,1,Hp)

    return win_p, bin_p, uwzgr, bzgr, uwh, bh_p, wout_p, bout_p


def dgm_forward(params, x, *, batch_tile=256):
    """Run the DGM forward pass as a single Pallas kernel call."""
    win, wout = params[0], params[14]
    D, H = win.shape
    O = wout.shape[1]
    L = params[2].shape[0]
    assert L >= 1, "num_layers must be >= 1"

    B = x.shape[0]
    d_pad = _round_up(max(D, 1), 128)
    h_pad = _round_up(max(H, 1), 128)
    o_pad = _round_up(max(O, 1), 128)
    kc = d_pad + h_pad

    bt = min(_round_up(B, 8), batch_tile)     # sublane-aligned batch tile
    b_pad = _round_up(B, bt)
    nb = b_pad // bt

    x_p = jnp.pad(x.astype(jnp.float32), ((0, b_pad - B), (0, d_pad - D)))
    packed = pack_dgm_params(params, d_pad, h_pad, o_pad)
    win_p, bin_p, uwzgr, bzgr, uwh, bh_p, wout_p, bout_p = packed

    # --- advisory cost estimate -------------------------------------------------
    flops = 2.0 * b_pad * (d_pad * h_pad
                           + L * (kc * 3 * h_pad + kc * h_pad)
                           + h_pad * o_pad)
    bytes_acc = 4.0 * (x_p.size + sum(int(a.size) for a in packed) + b_pad * o_pad)

    # --- explicit VMEM budget (streamed layers double-buffered + residents) -----
    per_layer = 4 * (kc * 3 * h_pad + 3 * h_pad + kc * h_pad + h_pad)
    resident = 4 * (bt * d_pad + d_pad * h_pad + h_pad
                    + h_pad * o_pad + o_pad + bt * o_pad)
    scratch = 4 * (2 * bt * kc)
    vmem_need = 2 * per_layer + 2 * resident + scratch
    vmem_limit = min(max(2 * vmem_need + (4 << 20), 16 << 20), 64 << 20)

    in_specs = [
        pl.BlockSpec((bt, d_pad), lambda b, l: (b, 0)),            # x
        pl.BlockSpec((d_pad, h_pad), lambda b, l: (0, 0)),         # Win
        pl.BlockSpec((1, h_pad), lambda b, l: (0, 0)),             # bin
        pl.BlockSpec((1, kc, 3 * h_pad), lambda b, l: (l, 0, 0)),  # [U|W] for Z,G,R
        pl.BlockSpec((1, 1, 3 * h_pad), lambda b, l: (l, 0, 0)),   # b for Z,G,R
        pl.BlockSpec((1, kc, h_pad), lambda b, l: (l, 0, 0)),      # [U|W] for H
        pl.BlockSpec((1, 1, h_pad), lambda b, l: (l, 0, 0)),       # b for H
        pl.BlockSpec((h_pad, o_pad), lambda b, l: (0, 0)),         # Wout
        pl.BlockSpec((1, o_pad), lambda b, l: (0, 0)),             # bout
    ]

    out = pl.pallas_call(
        functools.partial(dgm_kernel, d_pad=d_pad, h_pad=h_pad, num_layers=L),
        out_shape=jax.ShapeDtypeStruct((b_pad, o_pad), jnp.float32),
        grid_spec=pltpu.PrefetchScalarGridSpec(
            num_scalar_prefetch=0,
            grid=(nb, L),
            in_specs=in_specs,
            out_specs=pl.BlockSpec((bt, o_pad), lambda b, l: (b, 0)),
            scratch_shapes=[pltpu.VMEM((bt, kc), jnp.float32),
                            pltpu.VMEM((bt, kc), jnp.float32)],
        ),
        compiler_params=pltpu.CompilerParams(
            dimension_semantics=("parallel", "arbitrary"),
            vmem_limit_bytes=int(vmem_limit),
        ),
        cost_estimate=pl.CostEstimate(
            flops=int(flops), transcendentals=0, bytes_accessed=int(bytes_acc)),
    )(x_p, win_p, bin_p, uwzgr, bzgr, uwh, bh_p, wout_p, bout_p)

    return out[:B, :O]


# ---------------------------------------------------------------------------
# Deterministic parameter initialization (xavier_uniform, gain=sqrt(2) for relu)
# ---------------------------------------------------------------------------
def xavier_uniform(key, fan_in, fan_out, gain=1.0):
    limit = gain * jnp.sqrt(6.0 / (fan_in + fan_out))
    return jax.random.uniform(key, (fan_in, fan_out), jnp.float32, -limit, limit)


def init_dgm_params(key, input_dim, output_dim, hidden_size, num_layers):
    gain_relu = float(jnp.sqrt(2.0))
    keys = jax.random.split(key, 2 + 8 * num_layers)
    ki = iter(range(len(keys)))

    # x_in Linear: torch weight (hidden, input) -> stored transposed (input, hidden)
    win = xavier_uniform(keys[next(ki)], input_dim, hidden_size, gain=1.0)
    bin_ = jnp.zeros((1, hidden_size), jnp.float32)

    def stack(fan_in, fan_out):
        return jnp.stack([
            xavier_uniform(keys[next(ki)], fan_in, fan_out, gain=gain_relu)
            for _ in range(num_layers)
        ])

    uz = stack(input_dim, hidden_size)
    ug = stack(input_dim, hidden_size)
    ur = stack(input_dim, hidden_size)
    uh = stack(input_dim, hidden_size)
    wz = stack(hidden_size, hidden_size)
    wg = stack(hidden_size, hidden_size)
    wr = stack(hidden_size, hidden_size)
    wh = stack(hidden_size, hidden_size)
    zeros_b = jnp.zeros((num_layers, 1, hidden_size), jnp.float32)
    bz, bg, br, bh = zeros_b, zeros_b, zeros_b, zeros_b

    # x_out Linear: torch weight (output, hidden) -> stored transposed (hidden, output)
    wout = xavier_uniform(keys[next(ki)], hidden_size, output_dim, gain=1.0)
    bout = jnp.zeros((1, output_dim), jnp.float32)

    return (win, bin_, uz, ug, ur, uh, wz, wg, wr, wh, bz, bg, br, bh, wout, bout)


# ---------------------------------------------------------------------------
# Pure-JAX reference (for correctness check)
# ---------------------------------------------------------------------------
def dgm_reference(params, x):
    (win, bin_, uz, ug, ur, uh, wz, wg, wr, wh, bz, bg, br, bh, wout, bout) = params
    relu = lambda a: jnp.maximum(a, 0.0)
    s = relu(x @ win + bin_)
    for l in range(uz.shape[0]):
        Z = relu(x @ uz[l] + s @ wz[l] + bz[l])
        G = relu(x @ ug[l] + s @ wg[l] + bg[l])
        R = relu(x @ ur[l] + s @ wr[l] + br[l])
        H = relu(x @ uh[l] + (s * R) @ wh[l] + bh[l])
        s = (1.0 - G) * H + Z * s
    return s @ wout + bout


if __name__ == "__main__":
    # Small shapes: batch=8, input_dim=4, hidden=32, output_dim=2, num_layers=3
    B, D, H, O, L = 8, 4, 32, 2, 3

    key = jax.random.PRNGKey(0)
    k_param, k_x = jax.random.split(key)
    params = init_dgm_params(k_param, D, O, H, L)
    x = jax.random.normal(k_x, (B, D), jnp.float32)

    out = dgm_forward(params, x)
    out = jax.block_until_ready(out)

    ref = dgm_reference(params, x)
    assert out.shape == (B, O), out.shape
    assert jnp.allclose(out, ref, atol=1e-4, rtol=1e-4), (out, ref)

    print("KERNEL_OK")
</pallas_src>

<mosaic_0001>
module attributes {stable_mosaic.version = 11 : i64} {
  func.func @dgm_kernel(%arg0: i32, %arg1: i32, %arg2: memref<8x128xf32, #tpu.memory_space<vmem>>, %arg3: memref<128x128xf32, #tpu.memory_space<vmem>>, %arg4: memref<1x128xf32, #tpu.memory_space<vmem>>, %arg5: memref<1x256x384xf32, #tpu.memory_space<vmem>>, %arg6: memref<1x1x384xf32, #tpu.memory_space<vmem>>, %arg7: memref<1x256x128xf32, #tpu.memory_space<vmem>>, %arg8: memref<1x1x128xf32, #tpu.memory_space<vmem>>, %arg9: memref<128x128xf32, #tpu.memory_space<vmem>>, %arg10: memref<1x128xf32, #tpu.memory_space<vmem>>, %arg11: memref<8x128xf32, #tpu.memory_space<vmem>>, %arg12: memref<8x256xf32, #tpu.memory_space<vmem>>, %arg13: memref<8x256xf32, #tpu.memory_space<vmem>>) attributes {dimension_semantics = [#tpu.dimension_semantics<parallel>, #tpu.dimension_semantics<arbitrary>], iteration_bounds = array<i64: 1, 3>, scalar_prefetch = 0 : i64, scratch_operands = 2 : i64, tpu.core_type = #tpu.core_type<tc>, window_params = [{transform_indices = @transform_0, window_bounds = array<i64: 8, 128>}, {pipeline_mode = #tpu.pipeline_mode<synchronous>, transform_indices = @transform_1, window_bounds = array<i64: 128, 128>}, {pipeline_mode = #tpu.pipeline_mode<synchronous>, transform_indices = @transform_2, window_bounds = array<i64: 1, 128>}, {transform_indices = @transform_3, window_bounds = array<i64: 1, 256, 384>}, {transform_indices = @transform_4, window_bounds = array<i64: 1, 1, 384>}, {transform_indices = @transform_5, window_bounds = array<i64: 1, 256, 128>}, {transform_indices = @transform_6, window_bounds = array<i64: 1, 1, 128>}, {pipeline_mode = #tpu.pipeline_mode<synchronous>, transform_indices = @transform_7, window_bounds = array<i64: 128, 128>}, {pipeline_mode = #tpu.pipeline_mode<synchronous>, transform_indices = @transform_8, window_bounds = array<i64: 1, 128>}, {transform_indices = @transform_9, window_bounds = array<i64: 8, 128>}]} {
    %c0_i32 = arith.constant 0 : i32
    %0 = arith.cmpi eq, %arg1, %c0_i32 : i32
    %1 = arith.extui %0 : i1 to i32
    %c0_i32_0 = arith.constant 0 : i32
    %2 = arith.cmpi ne, %1, %c0_i32_0 : i32
    scf.if %2 {
      %c0_24 = arith.constant 0 : index
      %c0_25 = arith.constant 0 : index
      %38 = vector.load %arg2[%c0_24, %c0_25] : memref<8x128xf32, #tpu.memory_space<vmem>>, vector<8x128xf32>
      %c0_26 = arith.constant 0 : index
      %c0_27 = arith.constant 0 : index
      %39 = vector.load %arg3[%c0_26, %c0_27] : memref<128x128xf32, #tpu.memory_space<vmem>>, vector<128x128xf32>
      %cst_28 = arith.constant dense<0.000000e+00> : vector<8x128xf32>
      %40 = tpu.matmul %38, %39, %cst_28 {dimension_numbers = #tpu.dot_dimension_numbers<[1], [0], [0], [1], [0, 0, 1, 1], [], []>} : vector<8x128xf32>, vector<128x128xf32>, vector<8x128xf32> -> vector<8x128xf32>
      %c0_29 = arith.constant 0 : index
      %c0_30 = arith.constant 0 : index
      %41 = vector.load %arg4[%c0_29, %c0_30] : memref<1x128xf32, #tpu.memory_space<vmem>>, vector<1x128xf32>
      %42 = vector.broadcast %41 : vector<1x128xf32> to vector<8x128xf32>
      %43 = arith.addf %40, %42 : vector<8x128xf32>
      %cst_31 = arith.constant 0.000000e+00 : f32
      %44 = vector.broadcast %cst_31 : f32 to vector<8x128xf32>
      %45 = arith.maximumf %43, %44 : vector<8x128xf32>
      %c0_32 = arith.constant 0 : index
      %c0_33 = arith.constant 0 : index
      %46 = vector.load %arg12[%c0_32, %c0_33] : memref<8x256xf32, #tpu.memory_space<vmem>>, vector<8x128xf32>
      tpu.vector_store %arg12[%c0_32, %c0_33], %38 {strides = array<i32>} : memref<8x256xf32, #tpu.memory_space<vmem>>, vector<8x128xf32>,
      %c0_34 = arith.constant 0 : index
      %c0_35 = arith.constant 0 : index
      %47 = vector.load %arg13[%c0_34, %c0_35] : memref<8x256xf32, #tpu.memory_space<vmem>>, vector<8x128xf32>
      tpu.vector_store %arg13[%c0_34, %c0_35], %38 {strides = array<i32>} : memref<8x256xf32, #tpu.memory_space<vmem>>, vector<8x128xf32>,
      %c0_36 = arith.constant 0 : index
      %c128_37 = arith.constant 128 : index
      %48 = vector.load %arg12[%c0_36, %c128_37] : memref<8x256xf32, #tpu.memory_space<vmem>>, vector<8x128xf32>
      tpu.vector_store %arg12[%c0_36, %c128_37], %45 {strides = array<i32>} : memref<8x256xf32, #tpu.memory_space<vmem>>, vector<8x128xf32>,
    } else {
    }
    %c0 = arith.constant 0 : index
    %c0_1 = arith.constant 0 : index
    %3 = vector.load %arg12[%c0, %c0_1] : memref<8x256xf32, #tpu.memory_space<vmem>>, vector<8x256xf32>
    %4 = vector.extract_strided_slice %3 {offsets = [0, 128], sizes = [8, 128], strides = [1, 1]} : vector<8x256xf32> to vector<8x128xf32>
    %c0_2 = arith.constant 0 : index
    %c0_3 = arith.constant 0 : index
    %c0_4 = arith.constant 0 : index
    %5 = vector.load %arg5[%c0_2, %c0_3, %c0_4] : memref<1x256x384xf32, #tpu.memory_space<vmem>>, vector<1x256x384xf32>
    %6 = vector.shape_cast %5 : vector<1x256x384xf32> to vector<256x384xf32>
    %cst = arith.constant dense<0.000000e+00> : vector<8x384xf32>
    %7 = tpu.matmul %3, %6, %cst {dimension_numbers = #tpu.dot_dimension_numbers<[1], [0], [0], [1], [0, 0, 1, 1], [], []>} : vector<8x256xf32>, vector<256x384xf32>, vector<8x384xf32> -> vector<8x384xf32>
    %c0_5 = arith.constant 0 : index
    %c0_6 = arith.constant 0 : index
    %c0_7 = arith.constant 0 : index
    %8 = vector.load %arg6[%c0_5, %c0_6, %c0_7] : memref<1x1x384xf32, #tpu.memory_space<vmem>>, vector<1x1x384xf32>
    %9 = vector.shape_cast %8 : vector<1x1x384xf32> to vector<1x384xf32>
    %10 = vector.broadcast %9 : vector<1x384xf32> to vector<8x384xf32>
    %11 = arith.addf %7, %10 : vector<8x384xf32>
    %cst_8 = arith.constant 0.000000e+00 : f32
    %12 = vector.broadcast %cst_8 : f32 to vector<8x384xf32>
    %13 = arith.maximumf %11, %12 : vector<8x384xf32>
    %14 = vector.extract_strided_slice %13 {offsets = [0, 0], sizes = [8, 128], strides = [1, 1]} : vector<8x384xf32> to vector<8x128xf32>
    %15 = vector.extract_strided_slice %13 {offsets = [0, 128], sizes = [8, 128], strides = [1, 1]} : vector<8x384xf32> to vector<8x128xf32>
    %16 = vector.extract_strided_slice %13 {offsets = [0, 256], sizes = [8, 128], strides = [1, 1]} : vector<8x384xf32> to vector<8x128xf32>
    %17 = arith.mulf %4, %16 : vector<8x128xf32>
    %c0_9 = arith.constant 0 : index
    %c128 = arith.constant 128 : index
    %18 = vector.load %arg13[%c0_9, %c128] : memref<8x256xf32, #tpu.memory_space<vmem>>, vector<8x128xf32>
    tpu.vector_store %arg13[%c0_9, %c128], %17 {strides = array<i32>} : memref<8x256xf32, #tpu.memory_space<vmem>>, vector<8x128xf32>,
    %c0_10 = arith.constant 0 : index
    %c0_11 = arith.constant 0 : index
    %19 = vector.load %arg13[%c0_10, %c0_11] : memref<8x256xf32, #tpu.memory_space<vmem>>, vector<8x256xf32>
    %c0_12 = arith.constant 0 : index
    %c0_13 = arith.constant 0 : index
    %c0_14 = arith.constant 0 : index
    %20 = vector.load %arg7[%c0_12, %c0_13, %c0_14] : memref<1x256x128xf32, #tpu.memory_space<vmem>>, vector<1x256x128xf32>
    %21 = vector.shape_cast %20 : vector<1x256x128xf32> to vector<256x128xf32>
    %cst_15 = arith.constant dense<0.000000e+00> : vector<8x128xf32>
    %22 = tpu.matmul %19, %21, %cst_15 {dimension_numbers = #tpu.dot_dimension_numbers<[1], [0], [0], [1], [0, 0, 1, 1], [], []>} : vector<8x256xf32>, vector<256x128xf32>, vector<8x128xf32> -> vector<8x128xf32>
    %c0_16 = arith.constant 0 : index
    %c0_17 = arith.constant 0 : index
    %c0_18 = arith.constant 0 : index
    %23 = vector.load %arg8[%c0_16, %c0_17, %c0_18] : memref<1x1x128xf32, #tpu.memory_space<vmem>>, vector<1x1x128xf32>
    %24 = vector.shape_cast %23 : vector<1x1x128xf32> to vector<1x128xf32>
    %25 = vector.broadcast %24 : vector<1x128xf32> to vector<8x128xf32>
    %26 = arith.addf %22, %25 : vector<8x128xf32>
    %cst_19 = arith.constant 0.000000e+00 : f32
    %27 = vector.broadcast %cst_19 : f32 to vector<8x128xf32>
    %28 = arith.maximumf %26, %27 : vector<8x128xf32>
    %cst_20 = arith.constant 1.000000e+00 : f32
    %29 = vector.broadcast %cst_20 : f32 to vector<8x128xf32>
    %30 = arith.subf %29, %15 : vector<8x128xf32>
    %31 = arith.mulf %30, %28 : vector<8x128xf32>
    %32 = arith.mulf %14, %4 : vector<8x128xf32>
    %33 = arith.addf %31, %32 : vector<8x128xf32>
    %c0_21 = arith.constant 0 : index
    %c128_22 = arith.constant 128 : index
    %34 = vector.load %arg12[%c0_21, %c128_22] : memref<8x256xf32, #tpu.memory_space<vmem>>, vector<8x128xf32>
    tpu.vector_store %arg12[%c0_21, %c128_22], %33 {strides = array<i32>} : memref<8x256xf32, #tpu.memory_space<vmem>>, vector<8x128xf32>,
    %c2_i32 = arith.constant 2 : i32
    %35 = arith.cmpi eq, %arg1, %c2_i32 : i32
    %36 = arith.extui %35 : i1 to i32
    %c0_i32_23 = arith.constant 0 : i32
    %37 = arith.cmpi ne, %36, %c0_i32_23 : i32
    scf.if %37 {
      %c0_24 = arith.constant 0 : index
      %c0_25 = arith.constant 0 : index
      %38 = vector.load %arg9[%c0_24, %c0_25] : memref<128x128xf32, #tpu.memory_space<vmem>>, vector<128x128xf32>
      %cst_26 = arith.constant dense<0.000000e+00> : vector<8x128xf32>
      %39 = tpu.matmul %33, %38, %cst_26 {dimension_numbers = #tpu.dot_dimension_numbers<[1], [0], [0], [1], [0, 0, 1, 1], [], []>} : vector<8x128xf32>, vector<128x128xf32>, vector<8x128xf32> -> vector<8x128xf32>
      %c0_27 = arith.constant 0 : index
      %c0_28 = arith.constant 0 : index
      %40 = vector.load %arg10[%c0_27, %c0_28] : memref<1x128xf32, #tpu.memory_space<vmem>>, vector<1x128xf32>
      %41 = vector.broadcast %40 : vector<1x128xf32> to vector<8x128xf32>
      %42 = arith.addf %39, %41 : vector<8x128xf32>
      %c0_29 = arith.constant 0 : index
      %c0_30 = arith.constant 0 : index
      %43 = vector.load %arg11[%c0_29, %c0_30] : memref<8x128xf32, #tpu.memory_space<vmem>>, vector<8x128xf32>
      tpu.vector_store %arg11[%c0_29, %c0_30], %42 {strides = array<i32>} : memref<8x128xf32, #tpu.memory_space<vmem>>, vector<8x128xf32>,
    } else {
    }
    return
  }
  func.func @transform_0(%arg0: i32, %arg1: i32) -> (i32, i32) {
    %c0_i32 = arith.constant 0 : i32
    %c0_i32_0 = arith.constant 0 : i32
    return %arg0, %c0_i32 : i32, i32
  }
  func.func @transform_1(%arg0: i32, %arg1: i32) -> (i32, i32) {
    %c0_i32 = arith.constant 0 : i32
    %c0_i32_0 = arith.constant 0 : i32
    %c0_i32_1 = arith.constant 0 : i32
    return %c0_i32, %c0_i32_0 : i32, i32
  }
  func.func @transform_2(%arg0: i32, %arg1: i32) -> (i32, i32) {
    %c0_i32 = arith.constant 0 : i32
    %c0_i32_0 = arith.constant 0 : i32
    %c0_i32_1 = arith.constant 0 : i32
    return %c0_i32, %c0_i32_0 : i32, i32
  }
  func.func @transform_3(%arg0: i32, %arg1: i32) -> (i32, i32, i32) {
    %c0_i32 = arith.constant 0 : i32
    %c0_i32_0 = arith.constant 0 : i32
    %c0_i32_1 = arith.constant 0 : i32
    return %arg1, %c0_i32, %c0_i32_0 : i32, i32, i32
  }
  func.func @transform_4(%arg0: i32, %arg1: i32) -> (i32, i32, i32) {
    %c0_i32 = arith.constant 0 : i32
    %c0_i32_0 = arith.constant 0 : i32
    %c0_i32_1 = arith.constant 0 : i32
    return %arg1, %c0_i32, %c0_i32_0 : i32, i32, i32
  }
  func.func @transform_5(%arg0: i32, %arg1: i32) -> (i32, i32, i32) {
    %c0_i32 = arith.constant 0 : i32
    %c0_i32_0 = arith.constant 0 : i32
    %c0_i32_1 = arith.constant 0 : i32
    return %arg1, %c0_i32, %c0_i32_0 : i32, i32, i32
  }
  func.func @transform_6(%arg0: i32, %arg1: i32) -> (i32, i32, i32) {
    %c0_i32 = arith.constant 0 : i32
    %c0_i32_0 = arith.constant 0 : i32
    %c0_i32_1 = arith.constant 0 : i32
    return %arg1, %c0_i32, %c0_i32_0 : i32, i32, i32
  }
  func.func @transform_7(%arg0: i32, %arg1: i32) -> (i32, i32) {
    %c0_i32 = arith.constant 0 : i32
    %c0_i32_0 = arith.constant 0 : i32
    %c0_i32_1 = arith.constant 0 : i32
    return %c0_i32, %c0_i32_0 : i32, i32
  }
  func.func @transform_8(%arg0: i32, %arg1: i32) -> (i32, i32) {
    %c0_i32 = arith.constant 0 : i32
    %c0_i32_0 = arith.constant 0 : i32
    %c0_i32_1 = arith.constant 0 : i32
    return %c0_i32, %c0_i32_0 : i32, i32
  }
  func.func @transform_9(%arg0: i32, %arg1: i32) -> (i32, i32) {
    %c0_i32 = arith.constant 0 : i32
    %c0_i32_0 = arith.constant 0 : i32
    return %arg0, %c0_i32 : i32, i32
  }
}

</mosaic_0001>

<bundles_post_ra>
// kernel: tpu_custom_call.1
= control target key start
LH: loop header
LB: loop body
LE: loop exit
PB: predicated region body
PF: predicated region fallthrough
CT: control target
= control target key end

     0   :  { %s2781_s0 = inlined_call_operand.hbm [shape: f32[8,128], index: 0, kind: input, shape index: {}]   ;;  %s2782_s1 = inlined_call_operand.hbm [shape: f32[128,128], index: 1, kind: input, shape index: {}]   ;;  %s2783_s2 = inlined_call_operand.hbm [shape: f32[1,128], index: 2, kind: input, shape index: {}]   ;;  %s2784_s3 = inlined_call_operand.hbm [shape: f32[3,256,384], index: 3, kind: input, shape index: {}]   ;;  %s2785_s4 = inlined_call_operand.hbm [shape: f32[3,1,384], index: 4, kind: input, shape index: {}]   ;;  %s2786_s5 = inlined_call_operand.hbm [shape: f32[3,256,128], index: 5, kind: input, shape index: {}]   ;;  %s2787_s6 = inlined_call_operand.hbm [shape: f32[3,1,128], index: 6, kind: input, shape index: {}]   ;;  %s2788_s7 = inlined_call_operand.hbm [shape: f32[128,128], index: 7, kind: input, shape index: {}]   ;;  %s2789_s8 = inlined_call_operand.hbm [shape: f32[1,128], index: 8, kind: input, shape index: {}]   ;;  %s2790_s9 = inlined_call_operand.hbm [shape: f32[8,128], index: 9, kind: output, shape index: {}]  }
   0x1   :  { %2810 = sst [smem:[#allocation32_spill]] %s2782_s1 }
   0x2   :  { %2811 = sst [smem:[#allocation33_spill]] %s2784_s3 }
   0x3   :  { %2812 = sst [smem:[#allocation34_spill]] %s2786_s5 }
   0x4   :  { %2813 = sst [smem:[#allocation35_spill]] %s2788_s7 }
   0x5   :  { %2814 = sst [smem:[#allocation36_spill]] %s2790_s9 }
   0x6   :  { %14 = vsyncpa [#allocation5], 0 }
   0x7   :  { %15 = vsyncpa [#allocation8], 0 }
   0x8   :  { %16 = vsyncpa [#allocation11], 0 }
   0x9   :  { %18 = vsyncpa [#allocation11 + $0x1], 0 }
   0xa   :  { %19 = vsyncpa [#allocation14], 0 }
   0xb   :  { %21 = vsyncpa [#allocation14 + $0x1], 0 }
   0xc   :  { %22 = vsyncpa [#allocation17], 0 }
   0xd   :  { %23 = vsyncpa [#allocation6], 0  ;;  %s2249_s30 = smov 0   ;;  %s2251_s10 = smov 0  }
   0xe   :  { %s2253_s11 = smov 0   ;;  %s2255_s12 = smov 0  }
   0xf   :  { %s2257_s13 = smov 0   ;;  %s2259_s14 = smov 0  }
  0x10 LB: > { %2815 = sst [smem:[#allocation26_spill]] %s2165_s11  ;;  %s2278_s15 = sadd.s32 4294967295, %s2177_s14   ;;  %s2177_s14 = sphi %s2259_s14, %s29_s14   ;;  %s2173_s13 = sphi %s2257_s13, %s2859_s13   ;;  %s2169_s12 = sphi %s2255_s12, %s2858_s12   ;;  %s2165_s11 = sphi %s2253_s11, %s2854_s11   ;;  %s2161_s10 = sphi %s2251_s10, %s2857_s10   ;;  %s2157_s30 = sphi %s2249_s30, %s2856_s30  }
  0x11   : > { %2816 = sst [smem:[#allocation27_spill]] %s2169_s12  ;;  %p129_p0 = scmp.ne.s32.totalorder %s2161_s10, %s2157_s30 }
  0x12   : > { %2817 = sst [smem:[#allocation28_spill]] %s2177_s14  ;;  %p2791_p1 = scmp.eq.s32.totalorder %s2278_s15, 0 }
  0x13   : > { %p1297_p2 = scmp.ge.s32.totalorder %s2177_s14, 1  ;;  %p286_p3 = scmp.lt.s32.totalorder %s2177_s14, 4 }
  0x14   : > { %p2286_p4 = por %p2791_p1, %p129_p0  ;;  %s2179_s18 = smov [#allocation7]  }
  0x15   : > { %p2290_p5 = pnand %p1297_p2, %p286_p3  ;;  %s311_s19 = sshll.u32 %s2179_s18, 4  ;;  %s312_s19 = int_to_ptr.vmem [resolvable:$true] %s311_s19 }
  0x16   : > { %s2818_s16 = scalar_select %p2286_p4, 1, 0 }
  0x17   : > { %s2820_s17 = scalar_select %p2290_p5, 1, 0 }
  0x18   : > { %2819 = sst [smem:[#allocation29_spill]] %s2818_s16  ;;  %p1715_p6 = pneg %p2290_p5 }
  0x19   : > { %s2180_s21 = smov [#allocation16]   ;;  %s2822_s1 = sld [smem:[#allocation32_spill]] }
  0x1a   : > { %p2298_p7 = pnand %p1715_p6, %p2791_p1  ;;  %s335_s22 = sshll.u32 %s2180_s21, 4  ;;  %s2302_s22 = int_to_ptr.vmem [resolvable:$true] %s335_s22 }
  0x1c   : > { %s2821_s20 = scalar_select %p2298_p7, 1, 0 }
  0x1d   : > { %p2312_p9 = pneg %p2298_p7 }
  0x1f   : > { %s1821_s25 = scalar_lea.hbm %s2822_s1, 2048 }
  0x20   : > { %p1822_p8 = scmp.ne.s32.totalorder %s2822_s1, %s1821_s25  ;;  %p1828_p12 = scmp.lt.u32.totalorder %s1821_s25, %s2822_s1 }
  0x21   : > { %s2823_s28 = scalar_select %p2312_p9, 1, 0 }
  0x22   : > { %p1824_p10 = pnand %p2312_p9, %p1822_p8 }
  0x24   : > { %p1825_p11 = pneg %p1824_p10 }
  0x26   : > { %p1830_p13 = pnand %p1828_p12, %p1825_p11 }
  0x28   : > { %1833 = shalt.err (!%p1830_p13)
}
  0x29   : > { %s1834_s18 = scalar_lea.vmem %s312_s19, 2048  ;;  %p1842_p6 = scmp.lt.s32.totalorder %s312_s19, %s312_s19 }
  0x2a   : > { %p1835_p0 = scmp.ne.s32.totalorder %s312_s19, %s1834_s18  ;;  %p1843_p1 = scmp.lt.s32.totalorder %s1834_s18, %s1834_s18 }
  0x2c   : > { %p1837_p2 = pnand %p1835_p0, %p2312_p9  ;;  %p1844_p4 = por %p1843_p1, %p1842_p6 }
  0x2e   : > { %p1838_p3 = pneg %p1837_p2 }
  0x30   : > { %p1845_p5 = pnand %p1844_p4, %p1838_p3 }
  0x32   : > { %1848 = shalt.err (!%p1845_p5)
}
  0x33   : > { %s2795_s21 = smov 128   ;;  %s2796_s23 = smov 8  }
  0x34   : > { %1721 = dma.hbm_to_vmem [thread:$0]  (!%p2298_p7), %s2822_s1, 2048, %s312_s19, [#allocation8], %s2795_s21, %s2795_s21, %s2796_s23  }
  0x35   : > { %s2824_s7 = sld [smem:[#allocation35_spill]] }
  0x3b   : > { %s1849_s29 = scalar_lea.hbm %s2824_s7, 2048 }
  0x3c   : > { %p1850_p1 = scmp.ne.s32.totalorder %s2824_s7, %s1849_s29  ;;  %p1856_p8 = scmp.lt.u32.totalorder %s1849_s29, %s2824_s7 }
  0x3e   : > { %p1852_p4 = pnand %p1850_p1, %p2312_p9 }
  0x40   : > { %p1853_p5 = pneg %p1852_p4 }
  0x42   : > { %p1858_p10 = pnand %p1856_p8, %p1853_p5 }
  0x44   : > { %1861 = shalt.err (!%p1858_p10)
}
  0x45   : > { %s1862_s19 = scalar_lea.vmem %s2302_s22, 2048  ;;  %p1870_p0 = scmp.lt.s32.totalorder %s2302_s22, %s2302_s22 }
  0x46   : > { %p1863_p11 = scmp.ne.s32.totalorder %s2302_s22, %s1862_s19  ;;  %p1871_p2 = scmp.lt.s32.totalorder %s1862_s19, %s1862_s19 }
  0x48   : > { %p1865_p12 = pnand %p1863_p11, %p2312_p9  ;;  %p1872_p3 = por %p1871_p2, %p1870_p0 }
  0x4a   : > { %p1866_p13 = pneg %p1865_p12 }
  0x4c   : > { %p1873_p6 = pnand %p1872_p3, %p1866_p13 }
  0x4e   : > { %1876 = shalt.err (!%p1873_p6)
}
  0x4f   : > { %1727 = dma.hbm_to_vmem [thread:$0]  (!%p2298_p7), %s2824_s7, 2048, %s2302_s22, [#allocation17], %s2795_s21, %s2795_s21, %s2796_s23  }
  0x50   : > { %s38_s24 = sadd.s32 1, %s2173_s13  ;;  %s116_s25 = sadd.s32 1, %s2165_s11 }
  0x51   : > { %p39_p1 = scmp.ge.s32.totalorder %s38_s24, 3  ;;  %p123_p4 = scmp.ne.s32.totalorder %s2165_s11, %s2161_s10 }
  0x52   : > { %p124_p5 = scmp.eq.s32.totalorder %s2177_s14, 0  ;;  %p1749_p8 = scmp.lt.s32.totalorder %s2177_s14, 3 }
  0x53   : > { %s2861_s24 = smov (%p39_p1, %s38_s24), 0  ;;  %s2369_s29 = sand.u32 1, %s2165_s11  }
  0x54   : > { %2825 = sst [smem:[#allocation30_spill]] %s2861_s24  ;;  %p125_p10 = por %p124_p5, %p123_p4 }
  0x55   : > { %s113_s27 = ssub.s32 %s2173_s13, %s2861_s24  ;;  %s1677_s30 = smul.u32 768, %s2369_s29 }
  0x56   : > { %p114_p11 = scmp.eq.s32.totalorder %s113_s27, 0  ;;  %p2372_p12 = pnand %p1749_p8, %p125_p10 }
  0x57   : > { %s1678_s19 = smul.u32 12288, %s2173_s13  ;;  %s364_s9 = scalar_lea.vmem [#allocation10], %s1677_s30 }
  0x58   : > { %s2826_s22 = scalar_select %p2372_p12, 1, 0 }
  0x59   : > { %s2377_s18 = scalar_select %p114_p11, %s2165_s11, %s116_s25  }
  0x5a   : > { %s371_s12 = sshll.u32 %s364_s9, 4  ;;  %s2828_s3 = sld [smem:[#allocation33_spill]]  ;;  %s2385_s12 = int_to_ptr.vmem [resolvable:$true] %s371_s12 }
  0x5b   : > { %2827 = sst [smem:[#allocation31_spill]] %s2377_s18  ;;  %s2829_s27 = sand.u32 1, %s2177_s14  }
  0x5c   : > { %s2389_s1 = scalar_lea.sflag [#allocation11], %s2829_s27  ;;  %p2395_p0 = pneg %p2372_p12 }
  0x5e   : > { %s2830_s25 = scalar_select %p2395_p0, 1, 0 }
  0x60   : > { %s2383_s26 = scalar_lea.hbm %s2828_s3, %s1678_s19  ;;  %s1882_s30 = scalar_lea.hbm %s2828_s3, 36864 }
  0x61   : > { %s1877_s7 = scalar_lea.hbm %s2383_s26, 12288  ;;  %p1883_p6 = scmp.lt.u32.totalorder %s2383_s26, %s2828_s3 }
  0x62   : > { %p1878_p13 = scmp.ne.s32.totalorder %s2383_s26, %s1877_s7  ;;  %p1884_p1 = scmp.lt.u32.totalorder %s1882_s30, %s1877_s7 }
  0x63   : > { %p1886_p5 = scmp.lt.u32.totalorder %s1877_s7, %s2383_s26 }
  0x64   : > { %p1880_p2 = pnand %p2395_p0, %p1878_p13  ;;  %p1885_p4 = por %p1884_p1, %p1883_p6 }
  0x66   : > { %p1881_p3 = pneg %p1880_p2  ;;  %p1887_p8 = por %p1886_p5, %p1885_p4 }
  0x68   : > { %p1888_p10 = pnand %p1887_p8, %p1881_p3 }
  0x6a   : > { %1891 = shalt.err (!%p1888_p10)
}
  0x6b   : > { %s1892_s27 = scalar_lea.vmem %s2385_s12, 12288  ;;  %s2183_s21 = smov [#allocation10]  }
  0x6c   : > { %p1893_p11 = scmp.ne.s32.totalorder %s2385_s12, %s1892_s27  ;;  %s1897_s23 = sshll.u32 %s2183_s21, 4  ;;  %s1898_s23 = int_to_ptr.vmem [resolvable:$false] %s1897_s23 }
  0x6d   : > { %s1899_s19 = scalar_lea.vmem %s1898_s23, 24576  ;;  %p1900_p7 = scmp.lt.s32.totalorder %s2385_s12, %s1898_s23 }
  0x6e   : > { %p1895_p13 = pnand %p1893_p11, %p2395_p0  ;;  %p1901_p9 = scmp.lt.s32.totalorder %s1899_s19, %s1892_s27 }
  0x70   : > { %p1896_p2 = pneg %p1895_p13  ;;  %p1902_p6 = por %p1901_p9, %p1900_p7 }
  0x72   : > { %p1903_p1 = pnand %p1902_p6, %p1896_p2 }
  0x74   : > { %1906 = shalt.err (!%p1903_p1)
}
  0x75   : > { %s2184_s7 = smov 384   ;;  %s2185_s30 = smov 24  }
  0x76   : > { %1734 = dma.hbm_to_vmem [thread:$0]  (!%p2372_p12), %s2383_s26, 12288, %s2385_s12, %s2389_s1, %s2184_s7, %s2184_s7, %s2185_s30  }
  0x77   : > { %s1306_s9 = sshll.u32 %s2369_s29, 8  ;;  %s1326_s21 = sshll.u32 %s2173_s13, 12 }
  0x78   : > { %s2831_s5 = sld [smem:[#allocation34_spill]]  ;;  %s404_s19 = scalar_lea.vmem [#allocation13], %s1306_s9 }
  0x79   : > { %s411_s24 = sshll.u32 %s404_s19, 4  ;;  %s2832_s18 = sand.u32 1, %s2177_s14   ;;  %s2426_s24 = int_to_ptr.vmem [resolvable:$true] %s411_s24 }
  0x7a   : > { %s2430_s11 = scalar_lea.sflag [#allocation14], %s2832_s18 }
  0x7e   : > { %s2424_s27 = scalar_lea.hbm %s2831_s5, %s1326_s21  ;;  %s1912_s12 = scalar_lea.hbm %s2831_s5, 12288 }
  0x7f   : > { %s1907_s16 = scalar_lea.hbm %s2424_s27, 4096  ;;  %p1913_p4 = scmp.lt.u32.totalorder %s2424_s27, %s2831_s5 }
  0x80   : > { %p1908_p7 = scmp.ne.s32.totalorder %s2424_s27, %s1907_s16  ;;  %p1914_p5 = scmp.lt.u32.totalorder %s1912_s12, %s1907_s16 }
  0x81   : > { %p1916_p10 = scmp.lt.u32.totalorder %s1907_s16, %s2424_s27 }
  0x82   : > { %p1910_p9 = pnand %p1908_p7, %p2395_p0  ;;  %p1915_p8 = por %p1914_p5, %p1913_p4 }
  0x84   : > { %p1911_p3 = pneg %p1910_p9  ;;  %p1917_p11 = por %p1916_p10, %p1915_p8 }
  0x86   : > { %p1918_p13 = pnand %p1917_p11, %p1911_p3 }
  0x88   : > { %1921 = shalt.err (!%p1918_p13)
}
  0x89   : > { %s1922_s18 = scalar_lea.vmem %s2426_s24, 4096  ;;  %s2186_s9 = smov [#allocation13]  }
  0x8a   : > { %p1923_p2 = scmp.ne.s32.totalorder %s2426_s24, %s1922_s18  ;;  %s1927_s21 = sshll.u32 %s2186_s9, 4  ;;  %s1928_s21 = int_to_ptr.vmem [resolvable:$false] %s1927_s21 }
  0x8b   : > { %s1929_s23 = scalar_lea.vmem %s1928_s21, 8192  ;;  %p1930_p7 = scmp.lt.s32.totalorder %s2426_s24, %s1928_s21 }
  0x8c   : > { %p1925_p6 = pnand %p1923_p2, %p2395_p0  ;;  %p1931_p9 = scmp.lt.s32.totalorder %s1929_s23, %s1922_s18 }
  0x8e   : > { %p1926_p1 = pneg %p1925_p6  ;;  %p1932_p4 = por %p1931_p9, %p1930_p7 }
  0x90   : > { %p1933_p5 = pnand %p1932_p4, %p1926_p1 }
  0x92   : > { %1936 = shalt.err (!%p1933_p5)
}
  0x93   : > { %s2833_s16 = smov 8   ;;  %s2834_s19 = smov 128  }
  0x94   : > { %1740 = dma.hbm_to_vmem [thread:$0]  (!%p2372_p12), %s2424_s27, 4096, %s2426_s24, %s2430_s11, %s2834_s19, %s2834_s19, %s2833_s16  }
  0x95   : > { %s2187_s26 = smov [#allocation4]   ;;  %s2188_s12 = smov [#allocation9]  }
  0x96   : > { %s301_s3 = sshll.u32 %s2187_s26, 4  ;;  %s325_s7 = sshll.u32 %s2188_s12, 4  ;;  %s302_s3 = int_to_ptr.vmem [resolvable:$true] %s301_s3  ;;  %s326_s7 = int_to_ptr.vmem [resolvable:$true] %s325_s7 }
  0x97   : > { %s1937_s9 = scalar_lea.hbm %s2781_s0, 128  ;;  %p2835_p8 = scmp.ne.s32.totalorder %s2823_s28, 0 }
  0x98   : > { %p1938_p3 = scmp.ne.s32.totalorder %s2781_s0, %s1937_s9  ;;  %p1944_p13 = scmp.lt.u32.totalorder %s1937_s9, %s2781_s0 }
  0x9a   : > { %p1940_p10 = pnand %p1938_p3, %p2835_p8 }
  0x9c   : > { %p1941_p11 = pneg %p1940_p10 }
  0x9e   : > { %p1946_p2 = pnand %p1944_p13, %p1941_p11 }
  0xa0   : > { %1949 = shalt.err (!%p1946_p2)
}
  0xa1   : > { %s1950_s24 = scalar_lea.vmem %s302_s3, 128  ;;  %p1958_p9 = scmp.lt.s32.totalorder %s302_s3, %s302_s3 }
  0xa2   : > { %p1951_p6 = scmp.ne.s32.totalorder %s302_s3, %s1950_s24  ;;  %p1959_p4 = scmp.lt.s32.totalorder %s1950_s24, %s1950_s24 }
  0xa4   : > { %p1953_p1 = pnand %p1951_p6, %p2835_p8  ;;  %p1960_p5 = por %p1959_p4, %p1958_p9 }
  0xa6   : > { %p1954_p7 = pneg %p1953_p1 }
  0xa8   : > { %p1961_p12 = pnand %p1960_p5, %p1954_p7 }
  0xaa   : > { %1964 = shalt.err (!%p1961_p12)
}
  0xab   : > { %p2836_p3 = scmp.ne.s32.totalorder %s2821_s20, 0  ;;  %s1965_s19 = scalar_lea.hbm %s2783_s2, 16 }
  0xac   : > { %p1966_p10 = scmp.ne.s32.totalorder %s2783_s2, %s1965_s19  ;;  %p1972_p12 = scmp.lt.u32.totalorder %s1965_s19, %s2783_s2 }
  0xad   : > { %1718 = dma.hbm_to_vmem [thread:$0]  (!%p2836_p3), %s2781_s0, 128, %s302_s3, [#allocation5]  }
  0xae   : > { %p1968_p11 = pnand %p1966_p10, %p2835_p8 }
  0xb0   : > { %p1969_p13 = pneg %p1968_p11 }
  0xb2   : > { %p1974_p2 = pnand %p1972_p12, %p1969_p13 }
  0xb4   : > { %1977 = shalt.err (!%p1974_p2)
}
  0xb5   : > { %s1978_s9 = scalar_lea.vmem %s326_s7, 16  ;;  %s1985_s3 = scalar_lea.vmem %s326_s7, 32 }
  0xb6   : > { %p1979_p6 = scmp.ne.s32.totalorder %s326_s7, %s1978_s9  ;;  %p1986_p9 = scmp.lt.s32.totalorder %s326_s7, %s326_s7 }
  0xb7   : > { %p1987_p4 = scmp.lt.s32.totalorder %s1985_s3, %s1978_s9 }
  0xb8   : > { %p1981_p1 = pnand %p1979_p6, %p2835_p8 }
  0xb9   : > { %p1988_p5 = por %p1987_p4, %p1986_p9 }
  0xba   : > { %p1982_p7 = pneg %p1981_p1 }
  0xbc   : > { %p1989_p0 = pnand %p1988_p5, %p1982_p7 }
  0xbe   : > { %1992 = shalt.err (!%p1989_p0)
}
  0xbf   : > { %1724 = dma.hbm_to_vmem [thread:$0]  (!%p2836_p3), %s2783_s2, 16, %s326_s7, [#allocation8]  }
  0xc0   : > { %s2189_s24 = smov [#allocation18]   ;;  %s1679_s16 = smul.u32 3, %s2369_s29 }
  0xc1   : > { %s349_s27 = sshll.u32 %s2189_s24, 4  ;;  %s1680_s5 = smul.u32 48, %s2173_s13  ;;  %s350_s27 = int_to_ptr.vmem [resolvable:$true] %s349_s27 }
  0xc2   : > { %s1993_s26 = scalar_lea.hbm %s2789_s8, 16 }
  0xc3   : > { %p1994_p0 = scmp.ne.s32.totalorder %s2789_s8, %s1993_s26  ;;  %p2000_p13 = scmp.lt.u32.totalorder %s1993_s26, %s2789_s8 }
  0xc5   : > { %p1996_p10 = pnand %p1994_p0, %p2835_p8 }
  0xc7   : > { %p1997_p11 = pneg %p1996_p10 }
  0xc9   : > { %p2002_p12 = pnand %p2000_p13, %p1997_p11 }
  0xcb   : > { %2005 = shalt.err (!%p2002_p12)
}
  0xcc   : > { %s2006_s7 = scalar_lea.vmem %s350_s27, 16  ;;  %s2013_s3 = scalar_lea.vmem %s350_s27, 32 }
  0xcd   : > { %p2007_p2 = scmp.ne.s32.totalorder %s350_s27, %s2006_s7  ;;  %p2014_p7 = scmp.lt.s32.totalorder %s350_s27, %s350_s27 }
  0xce   : > { %p2015_p9 = scmp.lt.s32.totalorder %s2013_s3, %s2006_s7 }
  0xcf   : > { %p2009_p6 = pnand %p2007_p2, %p2835_p8 }
  0xd0   : > { %p2016_p4 = por %p2015_p9, %p2014_p7 }
  0xd1   : > { %p2010_p1 = pneg %p2009_p6 }
  0xd3   : > { %p2017_p5 = pnand %p2016_p4, %p2010_p1 }
  0xd5   : > { %2020 = shalt.err (!%p2017_p5)
}
  0xd6   : > { %1730 = dma.hbm_to_vmem [thread:$0]  (!%p2836_p3), %s2789_s8, 16, %s350_s27, [#allocation17]  }
  0xd7   : > { %s2516_s28 = scalar_lea.hbm %s2785_s4, %s1680_s5  ;;  %s385_s19 = scalar_lea.vmem [#allocation12], %s1679_s16 }
  0xd8   : > { %s393_s26 = sshll.u32 %s385_s19, 4  ;;  %s1309_s12 = sshll.u32 %s2173_s13, 4  ;;  %s394_s26 = int_to_ptr.vmem [resolvable:$true] %s393_s26 }
  0xd9   : > { %s2021_s20 = scalar_lea.hbm %s2516_s28, 48  ;;  %p2837_p0 = scmp.ne.s32.totalorder %s2830_s25, 0 }
  0xda   : > { %p2022_p8 = scmp.ne.s32.totalorder %s2516_s28, %s2021_s20  ;;  %s2026_s18 = scalar_lea.hbm %s2785_s4, 144 }
  0xdb   : > { %p2027_p3 = scmp.lt.u32.totalorder %s2516_s28, %s2785_s4  ;;  %p2028_p13 = scmp.lt.u32.totalorder %s2026_s18, %s2021_s20 }
  0xdc   : > { %p2024_p10 = pnand %p2022_p8, %p2837_p0  ;;  %p2030_p2 = scmp.lt.u32.totalorder %s2021_s20, %s2516_s28 }
  0xdd   : > { %p2029_p12 = por %p2028_p13, %p2027_p3 }
  0xde   : > { %p2025_p11 = pneg %p2024_p10 }
  0xdf   : > { %p2031_p6 = por %p2030_p2, %p2029_p12 }
  0xe1   : > { %p2032_p1 = pnand %p2031_p6, %p2025_p11 }
  0xe3   : > { %2035 = shalt.err (!%p2032_p1)
}
  0xe4   : > { %s2036_s16 = scalar_lea.vmem %s394_s26, 48  ;;  %s2190_s7 = smov [#allocation12]  }
  0xe5   : > { %p2037_p7 = scmp.ne.s32.totalorder %s394_s26, %s2036_s16  ;;  %s2041_s3 = sshll.u32 %s2190_s7, 4  ;;  %s2042_s3 = int_to_ptr.vmem [resolvable:$false] %s2041_s3 }
  0xe6   : > { %s2043_s21 = scalar_lea.vmem %s2042_s3, 96  ;;  %p2044_p5 = scmp.lt.s32.totalorder %s394_s26, %s2042_s3 }
  0xe7   : > { %p2039_p9 = pnand %p2037_p7, %p2837_p0  ;;  %p2045_p8 = scmp.lt.s32.totalorder %s2043_s21, %s2036_s16 }
  0xe9   : > { %p2040_p4 = pneg %p2039_p9  ;;  %p2046_p10 = por %p2045_p8, %p2044_p5 }
  0xeb   : > { %p2047_p3 = pnand %p2046_p10, %p2040_p4 }
  0xed   : > { %2050 = shalt.err (!%p2047_p3)
}
  0xee   : > { %p2838_p13 = scmp.ne.s32.totalorder %s2826_s22, 0  ;;  %s2540_s14 = scalar_lea.hbm %s2787_s6, %s1309_s12 }
  0xef   : > { %s424_s19 = scalar_lea.vmem [#allocation15], %s2369_s29  ;;  %s2051_s30 = scalar_lea.hbm %s2540_s14, 16 }
  0xf0   : > { %1737 = dma.hbm_to_vmem [thread:$0]  (!%p2838_p13), %s2516_s28, 48, %s394_s26, %s2389_s1  }
  0xf1   : > { %s431_s20 = sshll.u32 %s424_s19, 4  ;;  %p2052_p11 = scmp.ne.s32.totalorder %s2540_s14, %s2051_s30  ;;  %s432_s20 = int_to_ptr.vmem [resolvable:$true] %s431_s20 }
  0xf2   : > { %s2056_s1 = scalar_lea.hbm %s2787_s6, 48  ;;  %p2057_p6 = scmp.lt.u32.totalorder %s2540_s14, %s2787_s6 }
  0xf3   : > { %p2054_p12 = pnand %p2052_p11, %p2837_p0  ;;  %p2058_p1 = scmp.lt.u32.totalorder %s2056_s1, %s2051_s30 }
  0xf4   : > { %p2060_p9 = scmp.lt.u32.totalorder %s2051_s30, %s2540_s14 }
  0xf5   : > { %p2055_p2 = pneg %p2054_p12  ;;  %p2059_p7 = por %p2058_p1, %p2057_p6 }
  0xf7   : > { %p2061_p4 = por %p2060_p9, %p2059_p7 }
  0xf9   : > { %p2062_p5 = pnand %p2061_p4, %p2055_p2 }
  0xfb   : > { %2065 = shalt.err (!%p2062_p5)
}
  0xfc   : > { %s2066_s29 = scalar_lea.vmem %s432_s20, 16  ;;  %s2191_s12 = smov [#allocation15]  }
  0xfd   : > { %p2067_p8 = scmp.ne.s32.totalorder %s432_s20, %s2066_s29  ;;  %s2071_s9 = sshll.u32 %s2191_s12, 4  ;;  %s2072_s9 = int_to_ptr.vmem [resolvable:$false] %s2071_s9 }
  0xfe   : > { %s2073_s5 = scalar_lea.vmem %s2072_s9, 32  ;;  %p2074_p11 = scmp.lt.s32.totalorder %s432_s20, %s2072_s9 }
  0xff   : > { %p2069_p10 = pnand %p2067_p8, %p2837_p0  ;;  %p2075_p12 = scmp.lt.s32.totalorder %s2073_s5, %s2066_s29 }
 0x101   : > { %p2070_p3 = pneg %p2069_p10  ;;  %p2076_p13 = por %p2075_p12, %p2074_p11 }
 0x103   : > { %p2077_p1 = pnand %p2076_p13, %p2070_p3 }
 0x105   : > { %2080 = shalt.err (!%p2077_p1)
}
 0x106   : > { %p2839_p6 = scmp.ne.s32.totalorder %s2826_s22, 0  ;;  %p2840_p2 = scmp.ne.s32.totalorder %s2820_s17, 0 }
 0x107   : > { %p2841_p0 = scmp.eq.s32.totalorder (!%p2840_p2), %s2278_s15, 0 }
 0x108   : > { %1743 = dma.hbm_to_vmem [thread:$0]  (!%p2839_p6), %s2540_s14, 16, %s432_s20, %s2430_s11  }
 0x109   : > { %440 = sbr.rel (%p2840_p2) target bundleno = 1276 (0x4fc), region = 56 }
 0x110   : > { %2132 = dma.done.wait (%p2841_p0), [#allocation5], 128   ;;  %p2842_p7 = pmov %p2841_p0 }
 0x111   : > { %p2843_p9 = pmov %p2841_p0 }
 0x112   : > { %2134 = vsyncadd (%p2842_p7), [#allocation5], 4294967168 }
 0x113   : > { %2136 = dma.done.wait (%p2843_p9), [#allocation8], 2064   ;;  %p2844_p13 = pmov %p2841_p0 }
 0x114   : > { %s2845_s22 = sld [smem:[#allocation29_spill]]  ;;  %s454_s25 = sand.u32 1, %s2278_s15  }
 0x115   : > { %2138 = vsyncadd (%p2844_p13), [#allocation8], 4294965232  ;;  %s2573_s11 = sand.u32 1, %s2161_s10   ;;  %s455_s16 = scalar_lea.sflag [#allocation11], %s454_s25 }
 0x116   : > { %s1681_s17 = smul.u32 768, %s2573_s11 }
 0x118   : > { %s2576_s7 = scalar_lea.vmem [#allocation10], %s1681_s17 }
 0x11a   : > { %p2846_p4 = scmp.ne.s32.totalorder %s2845_s22, 0 }
 0x11c   : > { %2140 = dma.done.wait (%p2846_p4), %s455_s16, 12336  }
 0x11d   : > { %2142 = vsyncadd (%p2846_p4), %s455_s16, 4294954960  ;;  %s1682_s3 = smul.u32 3, %s2573_s11  ;;  %s1314_s21 = sshll.u32 %s2573_s11, 8 }
 0x11e   : > { %s473_s24 = scalar_lea.sflag [#allocation14], %s454_s25  ;;  %s2586_s14 = scalar_lea.vmem [#allocation13], %s1314_s21 }
 0x11f   : > { %s2584_s23 = scalar_lea.vmem [#allocation12], %s1682_s3 }
 0x120   : > { %2144 = dma.done.wait (%p2846_p4), %s473_s24, 4112  }
 0x121   : > { %2146 = vsyncadd (%p2846_p4), %s473_s24, 4294963184  ;;  %s484_s19 = scalar_lea.vmem [#allocation15], %s2573_s11  ;;  %p2847_p5 = pmov %p2841_p0 }
 0x122   : > { %p2848_p8 = pmov %p2841_p0 }
 0x123   : > { %2148 = dma.done.wait (%p2847_p5), [#allocation17], 2064  }
 0x124   : > { %2150 = vsyncadd (%p2848_p8), [#allocation17], 4294965232  ;;  %s2849_s20 = sld [smem:[#allocation27_spill]] }
 0x12a   : > { %p1317_p10 = scmp.ne.s32.totalorder %s2849_s20, 0 }
 0x12b   : > { %v541_v0 = vld [vmem:[#allocation7] sm:$0xff] (!%p1317_p10)  ;;  %v542_v1 = vld [vmem:[#allocation7 + $0x8] sm:$0xff] (!%p1317_p10)  ;;  %v543_v2 = vld [vmem:[#allocation7 + $0x10] sm:$0xff] (!%p1317_p10)  ;;  %v2192_v3 = vmov (!%p1317_p10), 0.0|0.0   ;;  %vm2193_vm0 = vmmov (!%p1317_p10), 0   ;;  %v2194_v6 = vmov (!%p1317_p10), 0.0  }
 0x12c   : > { %539 = sbr.rel (%p1317_p10) target bundleno = 550 (0x226), region = 96  ;;  %1501 = vmatprep.subr.bf16.mxu0 (!%p1317_p10), %v2192_v3  ;;  %v1502_v4 = vpack.c.bf16 (!%p1317_p10), %v542_v1, %v541_v0  ;;  %v544_v5 = vld [vmem:[#allocation7 + $0x18] sm:$0xff] (!%p1317_p10)  ;;  %1463 = vmatprep.mubr.msk.f32.mxu0 (!%p1317_p10), %vm2193_vm0, %v2194_v6  ;;  %v545_v8 = vld [vmem:[#allocation7 + $0x20] sm:$0xff] (!%p1317_p10)  ;;  %v546_v9 = vld [vmem:[#allocation7 + $0x28] sm:$0xff] (!%p1317_p10) }
 0x12d   : > { %v1505_v7 = vpack.c.bf16 (!%p1317_p10), %v544_v5, %v543_v2  ;;  %v540_v10 = vld [vmem:[#allocation4] sm:$0xff] (!%p1317_p10)  ;;  %v1508_v11 = vpack.c.bf16 (!%p1317_p10), %v546_v9, %v545_v8  ;;  %v547_v12 = vld [vmem:[#allocation7 + $0x30] sm:$0xff] (!%p1317_p10)  ;;  %v549_v15 = vld [vmem:[#allocation7 + $0x40] sm:$0xff] (!%p1317_p10) }
 0x12e   : > { %1503 = vmatpush3.bf16.msra.mxu0 (!%p1317_p10), %v1502_v4  ;;  %635 = vst [vmem:[#allocation2] sm:$0xff] (!%p1317_p10), %v540_v10  ;;  %636 = vst [vmem:[#allocation3] sm:$0xff] (!%p1317_p10), %v540_v10  ;;  %v548_v13 = vld [vmem:[#allocation7 + $0x38] sm:$0xff] (!%p1317_p10)  ;;  %v550_v16 = vld [vmem:[#allocation7 + $0x48] sm:$0xff] (!%p1317_p10) }
 0x12f   : > { %1504 = vmatprep.subr.bf16.mxu0 (!%p1317_p10), %v2192_v3  ;;  %v1511_v14 = vpack.c.bf16 (!%p1317_p10), %v548_v13, %v547_v12  ;;  %v1514_v17 = vpack.c.bf16 (!%p1317_p10), %v550_v16, %v549_v15  ;;  %v551_v18 = vld [vmem:[#allocation7 + $0x50] sm:$0xff] (!%p1317_p10)  ;;  %v552_v19 = vld [vmem:[#allocation7 + $0x58] sm:$0xff] (!%p1317_p10)  ;;  %v553_v21 = vld [vmem:[#allocation7 + $0x60] sm:$0xff] (!%p1317_p10) }
 0x130   : > { %v1517_v20 = vpack.c.bf16 (!%p1317_p10), %v552_v19, %v551_v18  ;;  %v554_v22 = vld [vmem:[#allocation7 + $0x68] sm:$0xff] (!%p1317_p10)  ;;  %v555_v24 = vld [vmem:[#allocation7 + $0x70] sm:$0xff] (!%p1317_p10)  ;;  %v556_v25 = vld [vmem:[#allocation7 + $0x78] sm:$0xff] (!%p1317_p10) }
 0x131   : > { %v1520_v23 = vpack.c.bf16 (!%p1317_p10), %v554_v22, %v553_v21  ;;  %v1523_v26 = vpack.c.bf16 (!%p1317_p10), %v556_v25, %v555_v24  ;;  %v1318_v27 = vld [vmem:[#allocation9] ss:$0 sm:$0xff] (!%p1317_p10) }
 0x132   : > { %1506 = vmatpush3.bf16.msra.mxu0 (!%p1317_p10), %v1505_v7 }
 0x133   : > { %1507 = vmatprep.subr.bf16.mxu0 %v2192_v3 }
 0x136   : > { %1509 = vmatpush3.bf16.msra.mxu0 %v1508_v11 }
 0x137   : > { %1510 = vmatprep.subr.bf16.mxu0 %v2192_v3 }
 0x13a   : > { %1512 = vmatpush3.bf16.msra.mxu0 %v1511_v14 }
 0x13b   : > { %1513 = vmatprep.subr.bf16.mxu0 %v2192_v3 }
 0x13e   : > { %1515 = vmatpush3.bf16.msra.mxu0 %v1514_v17 }
 0x13f   : > { %1516 = vmatprep.subr.bf16.mxu0 %v2192_v3 }
 0x142   : > { %1518 = vmatpush3.bf16.msra.mxu0 %v1517_v20 }
 0x143   : > { %1519 = vmatprep.subr.bf16.mxu0 %v2192_v3 }
 0x146   : > { %1521 = vmatpush3.bf16.msra.mxu0 %v1520_v23 }
 0x147   : > { %1522 = vmatprep.subr.bf16.mxu0 %v2192_v3 }
 0x14a   : > { %1524 = vmatpush3.bf16.msra.mxu0 %v1523_v26 }
 0x14d   : > { %1464 = vmatmul.mubr.f32.vlgmr.msra.gmra.mrb[0].mxu0 %v540_v10 }
 0x220   : > { %v630_v28 = vpop.f32.mrb[0].mxu0 }
 0x221   : > { %v631_v29 = vadd.f32 %v1318_v27, %v630_v28  ;;  %v1465_v30 = vpop.f32.mrb[1].mxu0 }
 0x223   : > { %v634_v31 = vmax.f32 %v631_v29, 0.0 }
 0x225   : > { %637 = vst [vmem:[#allocation2 + $0x8] sm:$0xff] %v634_v31 }
 0x226 PF: > { %v690_v32 = vld [vmem:[%s2576_s7 + $0x190] sm:$0xff]  ;;  %v693_v33 = vld [vmem:[%s2576_s7 + $0x1a8] sm:$0xff]  ;;  %v696_v37 = vld [vmem:[%s2576_s7 + $0x1c0] sm:$0xff]  ;;  %s2850_s30 = sld [smem:[#allocation27_spill]] }
 0x227   : > { %v642_v34 = vld [vmem:[%s2576_s7 + $0x10] sm:$0xff]  ;;  %v1589_v35 = vpack.c.bf16 %v693_v33, %v690_v32  ;;  %v645_v36 = vld [vmem:[%s2576_s7 + $0x28] sm:$0xff]  ;;  %v699_v38 = vld [vmem:[%s2576_s7 + $0x1d8] sm:$0xff] }
 0x228   : > { %v1591_v39 = vpack.c.bf16 %v645_v36, %v642_v34  ;;  %v1593_v40 = vpack.c.bf16 %v699_v38, %v696_v37  ;;  %v648_v41 = vld [vmem:[%s2576_s7 + $0x40] sm:$0xff]  ;;  %v651_v42 = vld [vmem:[%s2576_s7 + $0x58] sm:$0xff]  ;;  %v702_v43 = vld [vmem:[%s2576_s7 + $0x1f0] sm:$0xff] }
 0x229   : > { %1590 = vmatprep.subr.bf16.mxu1 %v1589_v35  ;;  %v705_v44 = vld [vmem:[%s2576_s7 + $0x208] sm:$0xff]  ;;  %v1595_v45 = vpack.c.bf16 %v651_v42, %v648_v41  ;;  %v654_v47 = vld [vmem:[%s2576_s7 + $0x70] sm:$0xff]  ;;  %v708_v49 = vld [vmem:[%s2576_s7 + $0x220] sm:$0xff] }
 0x22a   : > { %1592 = vmatpush3.bf16.msra.mxu1 %v1591_v39  ;;  %v1597_v46 = vpack.c.bf16 %v705_v44, %v702_v43  ;;  %v657_v48 = vld [vmem:[%s2576_s7 + $0x88] sm:$0xff]  ;;  %v711_v50 = vld [vmem:[%s2576_s7 + $0x238] sm:$0xff]  ;;  %v660_v53 = vld [vmem:[%s2576_s7 + $0xa0] sm:$0xff] }
 0x22b   : > { %1594 = vmatprep.subr.bf16.mxu1 %v1593_v40  ;;  %v1599_v51 = vpack.c.bf16 %v657_v48, %v654_v47  ;;  %v1601_v52 = vpack.c.bf16 %v711_v50, %v708_v49  ;;  %v663_v54 = vld [vmem:[%s2576_s7 + $0xb8] sm:$0xff]  ;;  %v714_v55 = vld [vmem:[%s2576_s7 + $0x250] sm:$0xff]  ;;  %v717_v56 = vld [vmem:[%s2576_s7 + $0x268] sm:$0xff] }
 0x22c   : > { %v2616_v57 = vld [vmem:[#allocation2 + $0x8] sm:$0xff]  ;;  %v666_v58 = vld [vmem:[%s2576_s7 + $0xd0] sm:$0xff]  ;;  %v669_v59 = vld [vmem:[%s2576_s7 + $0xe8] sm:$0xff]  ;;  %v1603_v62 = vpack.c.bf16 %v663_v54, %v660_v53  ;;  %v1605_v4 = vpack.c.bf16 %v717_v56, %v714_v55  ;;  %p1320_p3 = scmp.ne.s32.totalorder %s2850_s30, 2 }
 0x22d   : > { %888 = vmatprep.mubr.f32.mxu1 %v2616_v57  ;;  %v641_v60 = vld [vmem:[%s2576_s7 + $0x8] sm:$0xff]  ;;  %v644_v61 = vld [vmem:[%s2576_s7 + $0x20] sm:$0xff]  ;;  %817 = vmatprep.mubr.f32.mxu0 %v2616_v57  ;;  %v643_v2 = vld [vmem:[%s2576_s7 + $0x18] sm:$0xff]  ;;  %v1607_v14 = vpack.c.bf16 %v669_v59, %v666_v58  ;;  %vm2196_vm1 = vmmov (!%p1320_p3), 0  }
 0x22e   : > { %1596 = vmatpush3.bf16.msra.mxu1 %v1595_v45  ;;  %v720_v63 = vld [vmem:[%s2576_s7 + $0x280] sm:$0xff]  ;;  %v1525_v0 = vpack.c.bf16 %v644_v61, %v641_v60  ;;  %v647_v3 = vld [vmem:[%s2576_s7 + $0x38] sm:$0xff]  ;;  %v650_v6 = vld [vmem:[%s2576_s7 + $0x50] sm:$0xff] }
 0x22f   : > { %1598 = vmatprep.subr.bf16.mxu1 %v1597_v46  ;;  %v640_v1 = vld [vmem:[%s2576_s7] sm:$0xff]  ;;  %v646_v7 = vld [vmem:[%s2576_s7 + $0x30] sm:$0xff]  ;;  %v649_v8 = vld [vmem:[%s2576_s7 + $0x48] sm:$0xff]  ;;  %v1529_v10 = vpack.c.bf16 %v650_v6, %v647_v3 }
 0x230   : > { %v1527_v5 = vpack.c.bf16 %v643_v2, %v640_v1  ;;  %v723_v9 = vld [vmem:[%s2576_s7 + $0x298] sm:$0xff]  ;;  %1526 = vmatprep.subr.bf16.mxu0 %v1525_v0  ;;  %v653_v11 = vld [vmem:[%s2576_s7 + $0x68] sm:$0xff]  ;;  %v656_v12 = vld [vmem:[%s2576_s7 + $0x80] sm:$0xff]  ;;  %v1531_v13 = vpack.c.bf16 %v649_v8, %v646_v7 }
 0x231   : > { %v672_v15 = vld [vmem:[%s2576_s7 + $0x100] sm:$0xff]  ;;  %v1533_v16 = vpack.c.bf16 %v656_v12, %v653_v11  ;;  %v655_v18 = vld [vmem:[%s2576_s7 + $0x78] sm:$0xff]  ;;  %v1609_v19 = vpack.c.bf16 %v723_v9, %v720_v63  ;;  %v662_v22 = vld [vmem:[%s2576_s7 + $0xb0] sm:$0xff] }
 0x232   : > { %1600 = vmatpush3.bf16.msra.mxu1 %v1599_v51  ;;  %1528 = vmatpush1.bf16.msra.mxu0 %v1527_v5  ;;  %v652_v17 = vld [vmem:[%s2576_s7 + $0x60] sm:$0xff]  ;;  %v675_v20 = vld [vmem:[%s2576_s7 + $0x118] sm:$0xff]  ;;  %v726_v23 = vld [vmem:[%s2576_s7 + $0x2b0] sm:$0xff] }
 0x233   : > { %1602 = vmatprep.subr.bf16.mxu1 %v1601_v52  ;;  %1530 = vmatprep.subr.bf16.mxu0 %v1529_v10  ;;  %v659_v21 = vld [vmem:[%s2576_s7 + $0x98] sm:$0xff]  ;;  %v729_v24 = vld [vmem:[%s2576_s7 + $0x2c8] sm:$0xff]  ;;  %v1535_v25 = vpack.c.bf16 %v655_v18, %v652_v17  ;;  %v1611_v26 = vpack.c.bf16 %v675_v20, %v672_v15  ;;  %v678_v27 = vld [vmem:[%s2576_s7 + $0x130] sm:$0xff] }
 0x234   : > { %v1537_v28 = vpack.c.bf16 %v662_v22, %v659_v21  ;;  %v658_v29 = vld [vmem:[%s2576_s7 + $0x90] sm:$0xff]  ;;  %v661_v30 = vld [vmem:[%s2576_s7 + $0xa8] sm:$0xff]  ;;  %v1613_v31 = vpack.c.bf16 %v729_v24, %v726_v23  ;;  %v668_v34 = vld [vmem:[%s2576_s7 + $0xe0] sm:$0xff] }
 0x235   : > { %v681_v32 = vld [vmem:[%s2576_s7 + $0x148] sm:$0xff]  ;;  %v732_v35 = vld [vmem:[%s2576_s7 + $0x2e0] sm:$0xff]  ;;  %v735_v36 = vld [vmem:[%s2576_s7 + $0x2f8] sm:$0xff]  ;;  %v1539_v37 = vpack.c.bf16 %v661_v30, %v658_v29 }
 0x236   : > { %1604 = vmatpush3.bf16.msra.mxu1 %v1603_v62  ;;  %1532 = vmatpush1.bf16.msra.mxu0 %v1531_v13  ;;  %v665_v33 = vld [vmem:[%s2576_s7 + $0xc8] sm:$0xff]  ;;  %v1615_v38 = vpack.c.bf16 %v681_v32, %v678_v27  ;;  %v684_v39 = vld [vmem:[%s2576_s7 + $0x160] sm:$0xff]  ;;  %v667_v42 = vld [vmem:[%s2576_s7 + $0xd8] sm:$0xff]  ;;  %v1617_v43 = vpack.c.bf16 %v735_v36, %v732_v35 }
 0x237   : > { %1606 = vmatprep.subr.bf16.mxu1 %v1605_v4  ;;  %1534 = vmatprep.subr.bf16.mxu0 %v1533_v16  ;;  %v1541_v40 = vpack.c.bf16 %v668_v34, %v665_v33  ;;  %v664_v41 = vld [vmem:[%s2576_s7 + $0xc0] sm:$0xff]  ;;  %v687_v44 = vld [vmem:[%s2576_s7 + $0x178] sm:$0xff]  ;;  %v674_v46 = vld [vmem:[%s2576_s7 + $0x110] sm:$0xff] }
 0x238   : > { %v671_v45 = vld [vmem:[%s2576_s7 + $0xf8] sm:$0xff]  ;;  %v917_v47 = vld [vmem:[%s2586_s14 + $0x80] sm:$0xff]  ;;  %v918_v48 = vld [vmem:[%s2586_s14 + $0x88] sm:$0xff]  ;;  %v1543_v49 = vpack.c.bf16 %v667_v42, %v664_v41  ;;  %v1619_v50 = vpack.c.bf16 %v687_v44, %v684_v39 }
 0x239   : > { %v1545_v51 = vpack.c.bf16 %v674_v46, %v671_v45  ;;  %v670_v52 = vld [vmem:[%s2576_s7 + $0xf0] sm:$0xff]  ;;  %v673_v53 = vld [vmem:[%s2576_s7 + $0x108] sm:$0xff]  ;;  %v680_v55 = vld [vmem:[%s2576_s7 + $0x140] sm:$0xff]  ;;  %v1621_v56 = vpack.c.bf16 %v918_v48, %v917_v47 }
 0x23a   : > { %1608 = vmatpush3.bf16.msra.mxu1 %v1607_v14  ;;  %1536 = vmatpush1.bf16.msra.mxu0 %v1535_v25  ;;  %v677_v54 = vld [vmem:[%s2576_s7 + $0x128] sm:$0xff]  ;;  %v919_v60 = vld [vmem:[%s2586_s14 + $0x90] sm:$0xff]  ;;  %v920_v61 = vld [vmem:[%s2586_s14 + $0x98] sm:$0xff]  ;;  %v1547_v63 = vpack.c.bf16 %v673_v53, %v670_v52 }
 0x23b   : > { %1610 = vmatprep.subr.bf16.mxu1 %v1609_v19  ;;  %1538 = vmatprep.subr.bf16.mxu0 %v1537_v28  ;;  %v901_v58 = vld [vmem:[%s2586_s14] sm:$0xff]  ;;  %v902_v59 = vld [vmem:[%s2586_s14 + $0x8] sm:$0xff]  ;;  %v2666_v62 = vld [vmem:[#allocation2] sm:$0xff]  ;;  %v1549_v0 = vpack.c.bf16 %v680_v55, %v677_v54  ;;  %v1625_v6 = vpack.c.bf16 %v920_v61, %v919_v60 }
 0x23c   : > { %v676_v1 = vld [vmem:[%s2576_s7 + $0x120] sm:$0xff]  ;;  %v679_v2 = vld [vmem:[%s2576_s7 + $0x138] sm:$0xff]  ;;  %v1623_v4 = vpack.c.bf16 %v902_v59, %v901_v58  ;;  %v686_v5 = vld [vmem:[%s2576_s7 + $0x170] sm:$0xff] }
 0x23d   : > { %v683_v3 = vld [vmem:[%s2576_s7 + $0x158] sm:$0xff]  ;;  %v921_v9 = vld [vmem:[%s2586_s14 + $0xa0] sm:$0xff]  ;;  %v922_v10 = vld [vmem:[%s2586_s14 + $0xa8] sm:$0xff]  ;;  %v1551_v11 = vpack.c.bf16 %v679_v2, %v676_v1 }
 0x23e   : > { %1612 = vmatpush3.bf16.msra.mxu1 %v1611_v26  ;;  %1540 = vmatpush1.bf16.msra.mxu0 %v1539_v37  ;;  %v903_v7 = vld [vmem:[%s2586_s14 + $0x10] sm:$0xff]  ;;  %v904_v8 = vld [vmem:[%s2586_s14 + $0x18] sm:$0xff]  ;;  %v1553_v12 = vpack.c.bf16 %v686_v5, %v683_v3  ;;  %v685_v14 = vld [vmem:[%s2576_s7 + $0x168] sm:$0xff]  ;;  %v1629_v18 = vpack.c.bf16 %v922_v10, %v921_v9 }
 0x23f   : > { %1614 = vmatprep.subr.bf16.mxu1 %v1613_v31  ;;  %1542 = vmatprep.subr.bf16.mxu0 %v1541_v40  ;;  %v682_v13 = vld [vmem:[%s2576_s7 + $0x150] sm:$0xff]  ;;  %v689_v15 = vld [vmem:[%s2576_s7 + $0x188] sm:$0xff]  ;;  %v1627_v16 = vpack.c.bf16 %v904_v8, %v903_v7  ;;  %v692_v17 = vld [vmem:[%s2576_s7 + $0x1a0] sm:$0xff] }
 0x240   : > { %v905_v19 = vld [vmem:[%s2586_s14 + $0x20] sm:$0xff]  ;;  %v906_v20 = vld [vmem:[%s2586_s14 + $0x28] sm:$0xff]  ;;  %v923_v21 = vld [vmem:[%s2586_s14 + $0xb0] sm:$0xff]  ;;  %v1555_v23 = vpack.c.bf16 %v685_v14, %v682_v13  ;;  %v1557_v24 = vpack.c.bf16 %v692_v17, %v689_v15 }
 0x241   : > { %v924_v22 = vld [vmem:[%s2586_s14 + $0xb8] sm:$0xff]  ;;  %v1631_v27 = vpack.c.bf16 %v906_v20, %v905_v19  ;;  %v698_v29 = vld [vmem:[%s2576_s7 + $0x1d0] sm:$0xff]  ;;  %v697_v34 = vld [vmem:[%s2576_s7 + $0x1c8] sm:$0xff] }
 0x242   : > { %1616 = vmatpush3.bf16.msra.mxu1 %v1615_v38  ;;  %1544 = vmatpush1.bf16.msra.mxu0 %v1543_v49  ;;  %v688_v25 = vld [vmem:[%s2576_s7 + $0x180] sm:$0xff]  ;;  %v691_v26 = vld [vmem:[%s2576_s7 + $0x198] sm:$0xff]  ;;  %v1633_v30 = vpack.c.bf16 %v924_v22, %v923_v21  ;;  %v694_v33 = vld [vmem:[%s2576_s7 + $0x1b0] sm:$0xff] }
 0x243   : > { %1618 = vmatprep.subr.bf16.mxu1 %v1617_v43  ;;  %1546 = vmatprep.subr.bf16.mxu0 %v1545_v51  ;;  %v695_v28 = vld [vmem:[%s2576_s7 + $0x1b8] sm:$0xff]  ;;  %v1559_v31 = vpack.c.bf16 %v691_v26, %v688_v25  ;;  %v701_v35 = vld [vmem:[%s2576_s7 + $0x1e8] sm:$0xff]  ;;  %v704_v36 = vld [vmem:[%s2576_s7 + $0x200] sm:$0xff]  ;;  %v1563_v37 = vpack.c.bf16 %v697_v34, %v694_v33 }
 0x244   : > { %v1561_v32 = vpack.c.bf16 %v698_v29, %v695_v28  ;;  %v1565_v38 = vpack.c.bf16 %v704_v36, %v701_v35  ;;  %v700_v39 = vld [vmem:[%s2576_s7 + $0x1e0] sm:$0xff]  ;;  %v703_v40 = vld [vmem:[%s2576_s7 + $0x1f8] sm:$0xff]  ;;  %v710_v42 = vld [vmem:[%s2576_s7 + $0x230] sm:$0xff] }
 0x245   : > { %v707_v41 = vld [vmem:[%s2576_s7 + $0x218] sm:$0xff]  ;;  %v1567_v43 = vpack.c.bf16 %v703_v40, %v700_v39  ;;  %v706_v45 = vld [vmem:[%s2576_s7 + $0x210] sm:$0xff]  ;;  %v709_v46 = vld [vmem:[%s2576_s7 + $0x228] sm:$0xff] }
 0x246   : > { %1620 = vmatpush3.bf16.msra.mxu1 %v1619_v50  ;;  %1548 = vmatpush1.bf16.msra.mxu0 %v1547_v63  ;;  %v1569_v44 = vpack.c.bf16 %v710_v42, %v707_v41  ;;  %v1571_v47 = vpack.c.bf16 %v709_v46, %v706_v45  ;;  %v907_v48 = vld [vmem:[%s2586_s14 + $0x30] sm:$0xff]  ;;  %v908_v49 = vld [vmem:[%s2586_s14 + $0x38] sm:$0xff]  ;;  %v713_v51 = vld [vmem:[%s2576_s7 + $0x248] sm:$0xff] }
 0x247   : > { %1622 = vmatprep.subr.bf16.mxu1 %v1621_v56  ;;  %1550 = vmatprep.subr.bf16.mxu0 %v1549_v0  ;;  %v1635_v50 = vpack.c.bf16 %v908_v49, %v907_v48  ;;  %v716_v52 = vld [vmem:[%s2576_s7 + $0x260] sm:$0xff]  ;;  %v715_v55 = vld [vmem:[%s2576_s7 + $0x258] sm:$0xff]  ;;  %v926_v59 = vld [vmem:[%s2586_s14 + $0xc8] sm:$0xff] }
 0x248   : > { %v1573_v53 = vpack.c.bf16 %v716_v52, %v713_v51  ;;  %v712_v54 = vld [vmem:[%s2576_s7 + $0x240] sm:$0xff]  ;;  %v910_v61 = vld [vmem:[%s2586_s14 + $0x48] sm:$0xff]  ;;  %v719_v1 = vld [vmem:[%s2576_s7 + $0x278] sm:$0xff] }
 0x249   : > { %889 = vmatmul.mubr.f32.vlgmr.msra.gmra.mrb[0].mxu1 %v2666_v62  ;;  %v925_v56 = vld [vmem:[%s2586_s14 + $0xc0] sm:$0xff]  ;;  %v1575_v58 = vpack.c.bf16 %v715_v55, %v712_v54  ;;  %v722_v2 = vld [vmem:[%s2576_s7 + $0x290] sm:$0xff]  ;;  %v928_v8 = vld [vmem:[%s2586_s14 + $0xd8] sm:$0xff] }
 0x24a   : > { %1624 = vmatpush3.bf16.msra.mxu1 %v1623_v4  ;;  %1552 = vmatpush1.bf16.msra.mxu0 %v1551_v11  ;;  %v909_v60 = vld [vmem:[%s2586_s14 + $0x40] sm:$0xff]  ;;  %v1637_v63 = vpack.c.bf16 %v926_v59, %v925_v56  ;;  %v1577_v3 = vpack.c.bf16 %v722_v2, %v719_v1  ;;  %v718_v4 = vld [vmem:[%s2576_s7 + $0x270] sm:$0xff]  ;;  %v912_v10 = vld [vmem:[%s2586_s14 + $0x58] sm:$0xff] }
 0x24b   : > { %1626 = vmatprep.subr.bf16.mxu1 %v1625_v6  ;;  %1554 = vmatprep.subr.bf16.mxu0 %v1553_v12  ;;  %v1639_v0 = vpack.c.bf16 %v910_v61, %v909_v60  ;;  %v721_v5 = vld [vmem:[%s2576_s7 + $0x288] sm:$0xff]  ;;  %v927_v6 = vld [vmem:[%s2586_s14 + $0xd0] sm:$0xff]  ;;  %v728_v14 = vld [vmem:[%s2576_s7 + $0x2c0] sm:$0xff] }
 0x24c   : > { %v1579_v7 = vpack.c.bf16 %v721_v5, %v718_v4  ;;  %v911_v9 = vld [vmem:[%s2586_s14 + $0x50] sm:$0xff]  ;;  %v1641_v11 = vpack.c.bf16 %v928_v8, %v927_v6  ;;  %v725_v13 = vld [vmem:[%s2576_s7 + $0x2a8] sm:$0xff]  ;;  %v916_v34 = vld [vmem:[%s2586_s14 + $0x78] sm:$0xff] }
 0x24d   : > { %v1643_v12 = vpack.c.bf16 %v912_v10, %v911_v9  ;;  %v1581_v15 = vpack.c.bf16 %v728_v14, %v725_v13  ;;  %v727_v17 = vld [vmem:[%s2576_s7 + $0x2b8] sm:$0xff]  ;;  %v929_v19 = vld [vmem:[%s2586_s14 + $0xe0] sm:$0xff]  ;;  %v930_v20 = vld [vmem:[%s2586_s14 + $0xe8] sm:$0xff]  ;;  %v2195_v9 = vmov (!%p1320_p3), 0.0|0.0  }
 0x24e   : > { %1628 = vmatpush3.bf16.msra.mxu1 %v1627_v16  ;;  %1556 = vmatpush1.bf16.msra.mxu0 %v1555_v23  ;;  %v724_v16 = vld [vmem:[%s2576_s7 + $0x2a0] sm:$0xff]  ;;  %v1645_v22 = vpack.c.bf16 %v930_v20, %v929_v19  ;;  %v914_v23 = vld [vmem:[%s2586_s14 + $0x68] sm:$0xff]  ;;  %v731_v25 = vld [vmem:[%s2576_s7 + $0x2d8] sm:$0xff] }
 0x24f   : > { %1630 = vmatprep.subr.bf16.mxu1 %v1629_v18  ;;  %1558 = vmatprep.subr.bf16.mxu0 %v1557_v24  ;;  %v1583_v18 = vpack.c.bf16 %v727_v17, %v724_v16  ;;  %v913_v21 = vld [vmem:[%s2586_s14 + $0x60] sm:$0xff]  ;;  %v734_v26 = vld [vmem:[%s2576_s7 + $0x2f0] sm:$0xff]  ;;  %v736_v40 = vld [vmem:[%s2584_s23] sm:$0x7] }
 0x250   : > { %v1647_v24 = vpack.c.bf16 %v914_v23, %v913_v21  ;;  %v730_v28 = vld [vmem:[%s2576_s7 + $0x2d0] sm:$0xff]  ;;  %v733_v29 = vld [vmem:[%s2576_s7 + $0x2e8] sm:$0xff]  ;;  %v1022_v8 = vld [vmem:[#allocation16 + $0x10] sm:$0xff] (!%p1320_p3) }
 0x251   : > { %v915_v33 = vld [vmem:[%s2586_s14 + $0x70] sm:$0xff]  ;;  %v899_v48 = vld [vmem:[#allocation3] sm:$0xff] }
 0x252   : > { %1632 = vmatpush3.bf16.msra.mxu1 %v1631_v27  ;;  %1560 = vmatpush1.bf16.msra.mxu0 %v1559_v31  ;;  %v1585_v27 = vpack.c.bf16 %v734_v26, %v731_v25  ;;  %v1587_v31 = vpack.c.bf16 %v733_v29, %v730_v28  ;;  %v1651_v36 = vpack.c.bf16 %v916_v34, %v915_v33  ;;  %v1319_v59 = vld [vmem:[%s484_s19] ss:$0 sm:$0xff]  ;;  %v1020_v6 = vld [vmem:[#allocation16] sm:$0xff] (!%p1320_p3)  ;;  %v1026_v16 = vld [vmem:[#allocation16 + $0x30] sm:$0xff] (!%p1320_p3) }
 0x253   : > { %1634 = vmatprep.subr.bf16.mxu1 %v1633_v30  ;;  %1562 = vmatprep.subr.bf16.mxu0 %v1561_v32  ;;  %v931_v30 = vld [vmem:[%s2586_s14 + $0xf0] sm:$0xff]  ;;  %v932_v32 = vld [vmem:[%s2586_s14 + $0xf8] sm:$0xff]  ;;  %v1028_v19 = vld [vmem:[#allocation16 + $0x40] sm:$0xff] (!%p1320_p3) }
 0x254   : > { %v1649_v35 = vpack.c.bf16 %v932_v32, %v931_v30  ;;  %v1025_v14 = vld [vmem:[#allocation16 + $0x28] sm:$0xff] (!%p1320_p3)  ;;  %v1027_v17 = vld [vmem:[#allocation16 + $0x38] sm:$0xff] (!%p1320_p3)  ;;  %v1032_v25 = vld [vmem:[#allocation16 + $0x60] sm:$0xff] (!%p1320_p3) }
 0x255   : > { %v1029_v20 = vld [vmem:[#allocation16 + $0x48] sm:$0xff] (!%p1320_p3)  ;;  %v1031_v23 = vld [vmem:[#allocation16 + $0x58] sm:$0xff] (!%p1320_p3)  ;;  %v1034_v28 = vld [vmem:[#allocation16 + $0x70] sm:$0xff] (!%p1320_p3) }
 0x256   : > { %1564 = vmatpush1.bf16.msra.mxu0 %v1563_v37  ;;  %1636 = vmatpush3.bf16.msra.mxu1 %v1635_v50  ;;  %v738_v37 = vlaneseq  ;;  %v1666_v21 = vpack.c.bf16 (!%p1320_p3), %v1029_v20, %v1028_v19  ;;  %v1033_v26 = vld [vmem:[#allocation16 + $0x68] sm:$0xff] (!%p1320_p3)  ;;  %v1035_v29 = vld [vmem:[#allocation16 + $0x78] sm:$0xff] (!%p1320_p3) }
 0x257   : > { %1566 = vmatprep.subr.bf16.mxu0 %v1565_v38  ;;  %1638 = vmatprep.subr.bf16.mxu1 %v1637_v63  ;;  %v1675_v30 = vpack.c.bf16 (!%p1320_p3), %v1035_v29, %v1034_v28 }
 0x258   : > { %v739_v38 = vshrl.u32 %v738_v37, 7 }
 0x25a   : > { %1568 = vmatpush1.bf16.msra.mxu0 %v1567_v43  ;;  %1640 = vmatpush3.bf16.msra.mxu1 %v1639_v0  ;;  %v748_v39 = vsub.s32 2, %v739_v38  ;;  %v744_v51 = vsub.s32 1, %v739_v38 }
 0x25b   : > { %1570 = vmatprep.subr.bf16.mxu0 %v1569_v44  ;;  %1642 = vmatprep.subr.bf16.mxu1 %v1641_v11  ;;  %v1023_v11 = vld [vmem:[#allocation16 + $0x18] sm:$0xff] (!%p1320_p3) }
 0x25c   : > { %v749_v42 = vrot.slane %v736_v40, %v748_v39  ;;  %v745_v52 = vrot.slane %v736_v40, %v744_v51  ;;  %v1657_v13 = vpack.c.bf16 (!%p1320_p3), %v1023_v11, %v1022_v8 }
 0x25e   : > { %1572 = vmatpush1.bf16.msra.mxu0 %v1571_v47  ;;  %1644 = vmatpush3.bf16.msra.mxu1 %v1643_v12  ;;  %v2197_v12 = vmov (!%p1320_p3), 0.0  }
 0x25f   : > { %1574 = vmatprep.subr.bf16.mxu0 %v1573_v53  ;;  %1646 = vmatprep.subr.bf16.mxu1 %v1645_v22  ;;  %v1030_v22 = vld [vmem:[#allocation16 + $0x50] sm:$0xff] (!%p1320_p3) }
 0x262   : > { %1576 = vmatpush1.bf16.msra.mxu0 %v1575_v58  ;;  %1648 = vmatpush3.bf16.msra.mxu1 %v1647_v24  ;;  %v1669_v24 = vpack.c.bf16 (!%p1320_p3), %v1031_v23, %v1030_v22 }
 0x263   : > { %1578 = vmatprep.subr.bf16.mxu0 %v1577_v3  ;;  %1650 = vmatprep.subr.bf16.mxu1 %v1649_v35 }
 0x266   : > { %1580 = vmatpush1.bf16.msra.mxu0 %v1579_v7  ;;  %1652 = vmatpush3.bf16.msra.mxu1 %v1651_v36  ;;  %v1021_v7 = vld [vmem:[#allocation16 + $0x8] sm:$0xff] (!%p1320_p3) }
 0x267   : > { %1582 = vmatprep.subr.bf16.mxu0 %v1581_v15  ;;  %v1654_v10 = vpack.c.bf16 (!%p1320_p3), %v1021_v7, %v1020_v6 }
 0x26a   : > { %1584 = vmatpush1.bf16.msra.mxu0 %v1583_v18  ;;  %v1663_v18 = vpack.c.bf16 (!%p1320_p3), %v1027_v17, %v1026_v16 }
 0x26b   : > { %1586 = vmatprep.subr.bf16.mxu0 %v1585_v27  ;;  %v1672_v27 = vpack.c.bf16 (!%p1320_p3), %v1033_v26, %v1032_v25 }
 0x26e   : > { %1588 = vmatpush1.bf16.msra.mxu0 %v1587_v31  ;;  %v1321_v31 = vld [vmem:[#allocation18] ss:$0 sm:$0xff] (!%p1320_p3) }
 0x26f   : > { %1653 = vmatprep.subr.bf16.mxu0 (!%p1320_p3), %v2195_v9 }
 0x271   : > { %818 = vmatmul.mubr.f32.vlgmr.msra.gmra.mrb[0].mxu0 %v2666_v62  ;;  %v740_v62 = vsub.s32 0, %v739_v38 }
 0x272   : > { %1498 = vmatprep.mubr.msk.f32.mxu0 (!%p1320_p3), %vm2196_vm1, %v2197_v12  ;;  %1655 = vmatpush3.bf16.msra.mxu0 (!%p1320_p3), %v1654_v10 }
 0x273   : > { %v741_v53 = vrot.slane %v736_v40, %v740_v62  ;;  %1656 = vmatprep.subr.bf16.mxu0 (!%p1320_p3), %v2195_v9 }
 0x276   : > { %1658 = vmatpush3.bf16.msra.mxu0 (!%p1320_p3), %v1657_v13 }
 0x277   : > { %1659 = vmatprep.subr.bf16.mxu0 (!%p1320_p3), %v2195_v9 }
 0x31c   : > { %v1376_v41 = vpop.f32.mrb[0].mxu1 }
 0x31d   : > { %v1377_v43 = vpop.f32.mrb[1].mxu1 }
 0x31e   : > { %v1378_v44 = vadd.f32 %v1377_v43, %v1376_v41 }
 0x320   : > { %v891_v45 = vadd.f32 %v1378_v44, %v749_v42 }
 0x322   : > { %v896_v46 = vmax.f32 %v891_v45, 0.0 }
 0x324   : > { %v897_v47 = vmul.f32 %v896_v46, %v2616_v57 }
 0x326   : > { %1004 = vmatprep.mubr.f32.mxu1 %v897_v47 }
 0x327   : > { %1005 = vmatmul.mubr.f32.vlgmr.msra.gmra.mrb[2].mxu1 %v899_v48 }
 0x344   : > { %v819_v49 = vpop.f32.mrb[0].mxu0 }
 0x345   : > { %v821_v50 = vpop.f32.mrb[1].mxu0  ;;  %v820_v55 = vadd.f32 %v819_v49, %v741_v53 }
 0x346   : > { %v822_v54 = vadd.f32 %v821_v50, %v745_v52 }
 0x347   : > { %v894_v63 = vmax.f32 %v820_v55, 0.0 }
 0x348   : > { %v895_v56 = vmax.f32 %v822_v54, 0.0 }
 0x349   : > { %v1013_v3 = vmul.f32 %v894_v63, %v2616_v57  ;;  %v1024_v57 = vld [vmem:[#allocation16 + $0x20] sm:$0xff] (!%p1320_p3) }
 0x34a   : > { %v1011_v0 = vsub.f32 1.0, %v895_v56  ;;  %v1660_v15 = vpack.c.bf16 (!%p1320_p3), %v1025_v14, %v1024_v57 }
 0x34c   : > { %1661 = vmatpush3.bf16.msra.mxu0 (!%p1320_p3), %v1660_v15 }
 0x34d   : > { %1662 = vmatprep.subr.bf16.mxu0 (!%p1320_p3), %v2195_v9 }
 0x350   : > { %1664 = vmatpush3.bf16.msra.mxu0 (!%p1320_p3), %v1663_v18 }
 0x351   : > { %1665 = vmatprep.subr.bf16.mxu0 (!%p1320_p3), %v2195_v9 }
 0x354   : > { %1667 = vmatpush3.bf16.msra.mxu0 (!%p1320_p3), %v1666_v21 }
 0x355   : > { %1668 = vmatprep.subr.bf16.mxu0 (!%p1320_p3), %v2195_v9 }
 0x358   : > { %1670 = vmatpush3.bf16.msra.mxu0 (!%p1320_p3), %v1669_v24 }
 0x359   : > { %1671 = vmatprep.subr.bf16.mxu0 (!%p1320_p3), %v2195_v9 }
 0x35c   : > { %1673 = vmatpush3.bf16.msra.mxu0 (!%p1320_p3), %v1672_v27 }
 0x35d   : > { %1674 = vmatprep.subr.bf16.mxu0 (!%p1320_p3), %v2195_v9 }
 0x360   : > { %1676 = vmatpush3.bf16.msra.mxu0 (!%p1320_p3), %v1675_v30 }
 0x3fa   : > { %v1411_v58 = vpop.f32.mrb[2].mxu1 }
 0x3fb   : > { %v1412_v60 = vpop.f32.mrb[3].mxu1 }
 0x3fc   : > { %v1413_v61 = vadd.f32 %v1412_v60, %v1411_v58 }
 0x3fe   : > { %v1007_v1 = vadd.f32 %v1413_v61, %v1319_v59 }
 0x400   : > { %v1010_v2 = vmax.f32 %v1007_v1, 0.0  ;;  %1019 = sbr.rel (%p1320_p3) target bundleno = 1245 (0x4dd), region = 100 }
 0x402   : > { %v1012_v4 = vmul.f32 %v1011_v0, %v1010_v2 }
 0x404   : > { %v1014_v5 = vadd.f32 %v1013_v3, %v1012_v4 }
 0x406   : > { %1015 = vst [vmem:[#allocation2 + $0x8] sm:$0xff] %v1014_v5  ;;  %1499 = vmatmul.mubr.f32.vlgmr.msra.gmra.mrb[0].mxu0 (!%p1320_p3), %v1014_v5 }
 0x4d9   : > { %v1109_v32 = vpop.f32.mrb[0].mxu0 }
 0x4da   : > { %v1110_v33 = vadd.f32 %v1321_v31, %v1109_v32  ;;  %v1500_v34 = vpop.f32.mrb[1].mxu0 }
 0x4dc   : > { %1113 = vst [vmem:[#allocation19] sm:$0xff] %v1110_v33 }
 0x4dd PF: > { %p1755_p11 = scmp.eq.s32.totalorder %s2278_s15, 2  ;;  %s2198_s27 = smov [#allocation19]  }
 0x4de   : > { %s1123_s18 = sshll.u32 %s2198_s27, 4  ;;  %s1124_s18 = int_to_ptr.vmem [resolvable:$true] %s1123_s18 }
 0x4df   : > { %s2081_s1 = scalar_lea.vmem %s1124_s18, 128  ;;  %p2088_p2 = scmp.lt.s32.totalorder %s1124_s18, %s1124_s18 }
 0x4e0   : > { %p2082_p12 = scmp.ne.s32.totalorder %s1124_s18, %s2081_s1  ;;  %p2089_p0 = scmp.lt.s32.totalorder %s2081_s1, %s2081_s1 }
 0x4e2   : > { %p2083_p1 = pnand %p2082_p12, %p1755_p11  ;;  %p2090_p7 = por %p2089_p0, %p2088_p2 }
 0x4e4   : > { %p2084_p6 = pneg %p2083_p1 }
 0x4e6   : > { %p2091_p9 = pnand %p2090_p7, %p2084_p6 }
 0x4e8   : > { %2094 = shalt.err (!%p2091_p9)
}
 0x4e9   : > { %s2851_s29 = sld [smem:[#allocation36_spill]] }
 0x4ef   : > { %s2095_s12 = scalar_lea.hbm %s2851_s29, 128 }
 0x4f0   : > { %p2096_p13 = scmp.ne.s32.totalorder %s2851_s29, %s2095_s12  ;;  %p2101_p8 = scmp.lt.u32.totalorder %s2095_s12, %s2851_s29 }
 0x4f2   : > { %p2097_p4 = pnand %p2096_p13, %p1755_p11 }
 0x4f4   : > { %p2098_p5 = pneg %p2097_p4 }
 0x4f6   : > { %p2103_p10 = pnand %p2101_p8, %p2098_p5 }
 0x4f8   : > { %2106 = shalt.err (!%p2103_p10)
}
 0x4f9   : > { %1712 = dma.vmem_to_hbm [thread:$0]  (%p1755_p11), %s1124_s18, 128, %s2851_s29, [#allocation6]  }
 0x4fa   : > { %2152 = dma.done.wait (%p1755_p11), [#allocation6], 128  }
 0x4fb   : > { %2154 = vsyncadd (%p1755_p11), [#allocation6], 4294967168 }
 0x4fc PF: > { %s2852_s16 = sld [smem:[#allocation28_spill]]  ;;  %s2853_s7 = sld [smem:[#allocation26_spill]] }
 0x4fd   : > { %s2854_s11 = sld [smem:[#allocation31_spill]]  ;;  %s2855_s3 = sld [smem:[#allocation30_spill]] }
 0x4fe   : > { %s2856_s30 = smov %s2161_s10  ;;  %s2858_s12 = smov %s2173_s13 }
 0x502   : > { %s29_s14 = sadd.s32 1, %s2852_s16   ;;  %s2857_s10 = smov %s2853_s7 }
 0x503   : > { %p26_p3 = scmp.ge.s32.totalorder %s29_s14, 5   ;;  %s2859_s13 = smov %s2855_s3 }
 0x505   :  { %28 = sbr.rel (!%p26_p3) target bundleno = 16 (0x10), region = 159 }
 0x50c   :  { %1136 = vsyncpa [#allocation5], 1 }
 0x50d   :  { %1138 = vsyncpa [#allocation5 + $0x1], 1 }
 0x50e   :  { %1139 = vsyncpa [#allocation8], 1 }
 0x50f   :  { %1140 = vsyncpa [#allocation11], 1 }
 0x510   :  { %1142 = vsyncpa [#allocation11 + $0x1], 1 }
 0x511   :  { %1143 = vsyncpa [#allocation14], 1 }
 0x512   :  { %1145 = vsyncpa [#allocation14 + $0x1], 1 }
 0x513   :  { %1146 = vsyncpa [#allocation17], 1 }
 0x514   :  { %1147 = vsyncpa [#allocation6], 1 }
 0x515   :  { %1149 = vsyncpa [#allocation6 + $0x1], 1 }

</bundles_post_ra>
